<compile_context>
chip_gen: v6e
topology: v6e:2x2x1
jax: 0.10.0
libtpu: 0.0.40
codegen_flags: <defaults>
</compile_context>

<pallas_src>
import functools
import math

import jax
import jax.numpy as jnp
from jax import lax
from jax.experimental import pallas as pl
from jax.experimental.pallas import tpu as pltpu

LANE = 128


def _round_up(x, m):
    return (x + m - 1) // m * m


def _lcm(*vals):
    out = 1
    for v in vals:
        out = out * v // math.gcd(out, v)
    return out


def _pad2d(a, rows, cols):
    r, c = a.shape
    if r == rows and c == cols:
        return a
    return jnp.pad(a, ((0, rows - r), (0, cols - c)))


def _cparams(dimension_semantics, vmem_estimate_bytes):
    """CompilerParams with an explicit scoped-VMEM limit.

    Capped at 64 MiB so the same value is legal on v7x (64 MiB physical per
    TensorCore); floored at 32 MiB (raises v5e's 16 MiB scoped default).
    """
    limit = int(min(max(int(1.5 * vmem_estimate_bytes) + (8 << 20), 32 << 20),
                    64 << 20))
    return pltpu.CompilerParams(dimension_semantics=dimension_semantics,
                                vmem_limit_bytes=limit)


# ========================= fused single-kernel path ==========================
def _fused_gae_kernel(x_ref, w1_ref, w2_ref, adj_ref, o_ref, z_ref, *, tm):
    """Whole GAE forward; one decoder row tile of A_pred per grid step."""
    # Step 0: run the full encoder once; z lives in VMEM scratch for all steps.
    @pl.when(pl.program_id(0) == 0)
    def _():
        xw1 = jnp.dot(x_ref[...], w1_ref[...],
                      preferred_element_type=jnp.float32)
        h = jnp.maximum(
            jnp.dot(adj_ref[...], xw1, preferred_element_type=jnp.float32),
            0.0)
        hw2 = jnp.dot(h, w2_ref[...], preferred_element_type=jnp.float32)
        z_ref[...] = jnp.dot(adj_ref[...], hw2,
                             preferred_element_type=jnp.float32)

    # Every step: one row tile of sigmoid(z @ z^T).  z^T is folded into the
    # dot_general contraction, so no transpose is ever materialized.
    row0 = pl.multiple_of(pl.program_id(0) * tm, tm)
    z_tile = z_ref[pl.ds(row0, tm), :]
    s = lax.dot_general(z_tile, z_ref[...], (((1,), (1,)), ((), ())),
                        preferred_element_type=jnp.float32)
    o_ref[...] = jax.nn.sigmoid(s).astype(o_ref.dtype)


def gae_forward_fused(x, adj, w1, w2, *, tm=128):
    n, f = x.shape
    f2, h1 = w1.shape
    h1b, h2 = w2.shape
    assert f == f2 and h1 == h1b and adj.shape == (n, n)
    assert tm % 8 == 0 and (tm % LANE == 0 or LANE % tm == 0), tm

    n_p = _round_up(n, max(tm, LANE))
    f_p = _round_up(f, LANE)
    h1_p = _round_up(h1, LANE)
    h2_p = _round_up(h2, LANE)

    x_p = _pad2d(x, n_p, f_p)
    adj_p = _pad2d(adj, n_p, n_p)
    w1_p = _pad2d(w1, f_p, h1_p)
    w2_p = _pad2d(w2, h1_p, h2_p)

    kernel = functools.partial(_fused_gae_kernel, tm=tm)
    cost = pl.CostEstimate(
        flops=(2 * n_p * f_p * h1_p + 2 * n_p * n_p * h1_p
               + 2 * n_p * h1_p * h2_p + 2 * n_p * n_p * h2_p
               + 2 * n_p * n_p * h2_p),
        transcendentals=n_p * n_p,
        bytes_accessed=4 * (n_p * f_p + f_p * h1_p + h1_p * h2_p
                            + n_p * n_p + n_p * n_p),
    )
    # Residents (conservatively x2 for buffer allocation) + z scratch + out.
    vmem_est = (2 * 4 * (n_p * f_p + f_p * h1_p + h1_p * h2_p + n_p * n_p)
                + 4 * n_p * h2_p + 2 * 4 * tm * n_p)

    a_pred = pl.pallas_call(
        kernel,
        out_shape=jax.ShapeDtypeStruct((n_p, n_p), jnp.float32),
        grid_spec=pltpu.PrefetchScalarGridSpec(
            num_scalar_prefetch=0,
            grid=(n_p // tm,),
            in_specs=[
                pl.BlockSpec((n_p, f_p), lambda i: (0, 0)),    # x, resident
                pl.BlockSpec((f_p, h1_p), lambda i: (0, 0)),   # W1, resident
                pl.BlockSpec((h1_p, h2_p), lambda i: (0, 0)),  # W2, resident
                pl.BlockSpec((n_p, n_p), lambda i: (0, 0)),    # adj, resident
            ],
            out_specs=pl.BlockSpec((tm, n_p), lambda i: (i, 0)),
            scratch_shapes=[pltpu.VMEM((n_p, h2_p), jnp.float32)],  # z
        ),
        # Every step reads the scratch written at step 0 -> must stay serial.
        compiler_params=_cparams(("arbitrary",), vmem_est),
        cost_estimate=cost,
    )(x_p, w1_p, w2_p, adj_p)
    return a_pred[:n, :n]


# ============================ tiled streaming path ============================
def _dense_proj_kernel(x_ref, w_ref, o_ref):
    o_ref[...] = jnp.dot(x_ref[...], w_ref[...],
                         preferred_element_type=jnp.float32).astype(o_ref.dtype)


def dense_proj(x, w, *, out_dtype, tm):
    """x @ w, row-tiled.  No cross-step state -> fully parallel grid axis."""
    M, F = x.shape
    F2, H = w.shape
    assert F == F2 and M % tm == 0
    vmem_est = 4 * (2 * tm * F + 2 * F * H + 2 * tm * H)
    return pl.pallas_call(
        _dense_proj_kernel,
        out_shape=jax.ShapeDtypeStruct((M, H), out_dtype),
        grid_spec=pltpu.PrefetchScalarGridSpec(
            num_scalar_prefetch=0,
            grid=(M // tm,),
            in_specs=[
                pl.BlockSpec((tm, F), lambda i: (i, 0)),  # x row tile, streamed
                pl.BlockSpec((F, H), lambda i: (0, 0)),   # W, tiny, resident
            ],
            out_specs=pl.BlockSpec((tm, H), lambda i: (i, 0)),
        ),
        compiler_params=_cparams(("parallel",), vmem_est),
        cost_estimate=pl.CostEstimate(
            flops=2 * M * F * H, transcendentals=0,
            bytes_accessed=int(x.dtype.itemsize) * M * F
            + int(w.dtype.itemsize) * F * H + 4 * M * H),
    )(x, w)


def _spmm_act_kernel(adj_ref, xw_ref, o_ref, *, activation):
    # bf16 operands into the MXU, f32 accumulation; activation stays f32 on the
    # VPU (v5e has no bf16 VPU), cast only at the store.
    acc = jnp.dot(adj_ref[...], xw_ref[...], preferred_element_type=jnp.float32)
    if activation == "relu":
        acc = jnp.maximum(acc, 0.0)
    o_ref[...] = acc.astype(o_ref.dtype)


def spmm_act(adj, xw, *, activation, out_dtype, tm):
    """act(adj @ xw), adj row tiles streamed (bf16), xw resident; parallel grid."""
    M, N = adj.shape
    N2, H = xw.shape
    assert N == N2 and M % tm == 0
    kernel = functools.partial(_spmm_act_kernel, activation=activation)
    vmem_est = 4 * (2 * tm * N + 2 * N * H + 2 * tm * H)
    return pl.pallas_call(
        kernel,
        out_shape=jax.ShapeDtypeStruct((M, H), out_dtype),
        grid_spec=pltpu.PrefetchScalarGridSpec(
            num_scalar_prefetch=0,
            grid=(M // tm,),
            in_specs=[
                pl.BlockSpec((tm, N), lambda i: (i, 0)),  # adj tile, streamed
                pl.BlockSpec((N, H), lambda i: (0, 0)),   # xw, resident
            ],
            out_specs=pl.BlockSpec((tm, H), lambda i: (i, 0)),
        ),
        compiler_params=_cparams(("parallel",), vmem_est),
        cost_estimate=pl.CostEstimate(
            flops=2 * M * N * H, transcendentals=0,
            bytes_accessed=int(adj.dtype.itemsize) * M * N
            + int(xw.dtype.itemsize) * N * H + 4 * M * H),
    )(adj, xw)


def _decoder_kernel(zr_ref, zc_ref, o_ref):
    """sigmoid(z_row_tile @ z_col_tile^T); transpose folded into dot_general."""
    s = lax.dot_general(zr_ref[...], zc_ref[...], (((1,), (1,)), ((), ())),
                        preferred_element_type=jnp.float32)
    o_ref[...] = jax.nn.sigmoid(s).astype(o_ref.dtype)


def inner_product_decoder(z, *, tm, tn, out_dtype=jnp.float32):
    """2-D (row, col) grid keeps the VMEM footprint fixed regardless of M."""
    M, H = z.shape
    assert M % tm == 0 and M % tn == 0
    assert tm % 8 == 0 and tn % LANE == 0   # lane-dense output stores
    vmem_est = 4 * (2 * tm * H + 2 * tn * H + 2 * tm * tn)
    return pl.pallas_call(
        _decoder_kernel,
        out_shape=jax.ShapeDtypeStruct((M, M), out_dtype),
        grid_spec=pltpu.PrefetchScalarGridSpec(
            num_scalar_prefetch=0,
            grid=(M // tm, M // tn),
            in_specs=[
                pl.BlockSpec((tm, H), lambda i, j: (i, 0)),  # z row tile
                pl.BlockSpec((tn, H), lambda i, j: (j, 0)),  # z column tile
            ],
            out_specs=pl.BlockSpec((tm, tn), lambda i, j: (i, j)),
        ),
        compiler_params=_cparams(("parallel", "parallel"), vmem_est),
        cost_estimate=pl.CostEstimate(
            flops=2 * M * M * H, transcendentals=M * M,
            bytes_accessed=2 * int(z.dtype.itemsize) * M * H + 4 * M * M),
    )(z, z)


def gae_forward_tiled(x, adj, w1, w2, *, tm=256, tn=256):
    n, f = x.shape
    f2, h1 = w1.shape
    h1b, h2 = w2.shape
    assert f == f2 and h1 == h1b and adj.shape == (n, n)
    assert tm % 8 == 0 and tn % LANE == 0

    n_p = _round_up(n, _lcm(tm, tn, LANE))
    f_p = _round_up(f, LANE)
    h1_p = _round_up(h1, LANE)
    h2_p = _round_up(h2, LANE)

    bf16 = jnp.bfloat16
    # adj (read by both layers) is the dominant HBM stream: store it as bf16.
    adj_p = _pad2d(adj, n_p, n_p).astype(bf16)
    x_p = _pad2d(x, n_p, f_p).astype(bf16)
    w1_p = _pad2d(w1, f_p, h1_p).astype(bf16)
    w2_p = _pad2d(w2, h1_p, h2_p).astype(bf16)

    # Layer 1: xw hoisted into its own call so the adj-streaming kernel has no
    # step-0 scratch dependency and its grid axis can be megacore-parallel.
    xw1 = dense_proj(x_p, w1_p, out_dtype=bf16, tm=tm)
    h = spmm_act(adj_p, xw1, activation="relu", out_dtype=bf16, tm=tm)
    # Layer 2 (identity activation).
    hw2 = dense_proj(h, w2_p, out_dtype=bf16, tm=tm)
    z = spmm_act(adj_p, hw2, activation="none", out_dtype=bf16, tm=tm)
    # Decoder.  out_dtype could be bf16 to halve the N^2 writeback; kept f32
    # here so downstream consumers / the reference check see full precision.
    a_pred = inner_product_decoder(z, tm=tm, tn=tn, out_dtype=jnp.float32)
    return a_pred[:n, :n]


# --------------------------------- dispatcher ---------------------------------
def gae_forward(x, adj, w1, w2, *, fuse_max_nodes=1024, tm_fused=128,
                tm=256, tn=256):
    """GAE.forward: fused single-kernel path for small graphs (adj resident in
    VMEM), bf16-streaming tiled path otherwise.  fuse_max_nodes=1024 keeps the
    fused path's VMEM under v7x's 64 MiB; on v5e/v6e it can be raised to ~2k."""
    n = x.shape[0]
    if n <= fuse_max_nodes:
        return gae_forward_fused(x, adj, w1, w2, tm=tm_fused)
    return gae_forward_tiled(x, adj, w1, w2, tm=tm, tn=tn)


# ----------------------------------- glue -------------------------------------
def normalize_adj(a):
    """D^{-1/2} (A + I) D^{-1/2}, standard GCN normalization (not the hot path)."""
    n = a.shape[0]
    a = a + jnp.eye(n, dtype=a.dtype)
    deg = jnp.sum(a, axis=1)
    d_inv_sqrt = 1.0 / jnp.sqrt(deg)
    return a * d_inv_sqrt[:, None] * d_inv_sqrt[None, :]


def glorot(key, shape):
    fan_in, fan_out = shape
    limit = jnp.sqrt(6.0 / (fan_in + fan_out))
    return jax.random.uniform(key, shape, jnp.float32, -limit, limit)


if __name__ == "__main__":
    def make_problem(key, n, n_feats, n_hid1, n_hid2, p_edge=0.05):
        k_x, k_a, k_w1, k_w2 = jax.random.split(key, 4)
        x = jax.random.normal(k_x, (n, n_feats), dtype=jnp.float32)
        a_raw = (jax.random.uniform(k_a, (n, n)) < p_edge).astype(jnp.float32)
        a_sym = jnp.maximum(a_raw, a_raw.T)          # symmetric 0/1 adjacency
        adj = normalize_adj(a_sym)
        w1 = glorot(k_w1, (n_feats, n_hid1))
        w2 = glorot(k_w2, (n_hid1, n_hid2))
        return x, adj, w1, w2

    def reference(x, adj, w1, w2):
        h = jax.nn.relu(adj @ (x @ w1))
        z = adj @ (h @ w2)
        return jax.nn.sigmoid(z @ z.T)

    key = jax.random.PRNGKey(0)
    k_small, k_big = jax.random.split(key)

    # --- Small graph: fully fused single-kernel path (f32, tight check). ---
    n_small = 130                              # non-multiple of 128: pads to 256
    x, adj, w1, w2 = make_problem(k_small, n_small, 64, 64, 32)
    a_pred = jax.block_until_ready(gae_forward(x, adj, w1, w2))
    a_ref = reference(x, adj, w1, w2)
    assert a_pred.shape == (n_small, n_small)
    err = float(jnp.max(jnp.abs(a_pred - a_ref)))
    assert err < 1e-3, f"fused path error too large: {err}"

    # --- Larger graph: tiled path (bf16 adj stream, f32 accumulation). ---
    n_big = 500                                # pads to 512 (tm=tn=256)
    x2, adj2, w12, w22 = make_problem(k_big, n_big, 64, 64, 32)
    a_pred2 = jax.block_until_ready(
        gae_forward(x2, adj2, w12, w22, fuse_max_nodes=0, tm=256, tn=256))
    a_ref2 = reference(x2, adj2, w12, w22)
    assert a_pred2.shape == (n_big, n_big)
    err2 = float(jnp.max(jnp.abs(a_pred2 - a_ref2)))
    assert err2 < 3e-2, f"tiled (bf16) path error too large: {err2}"

    print("KERNEL_OK")
</pallas_src>

<mosaic_0001>
module attributes {stable_mosaic.version = 11 : i64} {
  func.func @_fused_gae_kernel(%arg0: i32, %arg1: memref<256x128xf32, #tpu.memory_space<vmem>>, %arg2: memref<128x128xf32, #tpu.memory_space<vmem>>, %arg3: memref<128x128xf32, #tpu.memory_space<vmem>>, %arg4: memref<256x256xf32, #tpu.memory_space<vmem>>, %arg5: memref<128x256xf32, #tpu.memory_space<vmem>>, %arg6: memref<256x128xf32, #tpu.memory_space<vmem>>) attributes {dimension_semantics = [#tpu.dimension_semantics<arbitrary>], iteration_bounds = array<i64: 2>, scalar_prefetch = 0 : i64, scratch_operands = 1 : i64, tpu.core_type = #tpu.core_type<tc>, window_params = [{pipeline_mode = #tpu.pipeline_mode<synchronous>, transform_indices = @transform_0, window_bounds = array<i64: 256, 128>}, {pipeline_mode = #tpu.pipeline_mode<synchronous>, transform_indices = @transform_1, window_bounds = array<i64: 128, 128>}, {pipeline_mode = #tpu.pipeline_mode<synchronous>, transform_indices = @transform_2, window_bounds = array<i64: 128, 128>}, {pipeline_mode = #tpu.pipeline_mode<synchronous>, transform_indices = @transform_3, window_bounds = array<i64: 256, 256>}, {transform_indices = @transform_4, window_bounds = array<i64: 128, 256>}]} {
    %c0_i32 = arith.constant 0 : i32
    %0 = arith.cmpi eq, %arg0, %c0_i32 : i32
    %1 = arith.extui %0 : i1 to i32
    %c0_i32_0 = arith.constant 0 : i32
    %2 = arith.cmpi ne, %1, %c0_i32_0 : i32
    scf.if %2 {
      %c0_6 = arith.constant 0 : index
      %c0_7 = arith.constant 0 : index
      %15 = vector.load %arg1[%c0_6, %c0_7] : memref<256x128xf32, #tpu.memory_space<vmem>>, vector<256x128xf32>
      %c0_8 = arith.constant 0 : index
      %c0_9 = arith.constant 0 : index
      %16 = vector.load %arg2[%c0_8, %c0_9] : memref<128x128xf32, #tpu.memory_space<vmem>>, vector<128x128xf32>
      %cst_10 = arith.constant dense<0.000000e+00> : vector<256x128xf32>
      %17 = tpu.matmul %15, %16, %cst_10 {dimension_numbers = #tpu.dot_dimension_numbers<[1], [0], [0], [1], [0, 0, 1, 1], [], []>} : vector<256x128xf32>, vector<128x128xf32>, vector<256x128xf32> -> vector<256x128xf32>
      %c0_11 = arith.constant 0 : index
      %c0_12 = arith.constant 0 : index
      %18 = vector.load %arg4[%c0_11, %c0_12] : memref<256x256xf32, #tpu.memory_space<vmem>>, vector<256x256xf32>
      %cst_13 = arith.constant dense<0.000000e+00> : vector<256x128xf32>
      %19 = tpu.matmul %18, %17, %cst_13 {dimension_numbers = #tpu.dot_dimension_numbers<[1], [0], [0], [1], [0, 0, 1, 1], [], []>} : vector<256x256xf32>, vector<256x128xf32>, vector<256x128xf32> -> vector<256x128xf32>
      %cst_14 = arith.constant 0.000000e+00 : f32
      %20 = vector.broadcast %cst_14 : f32 to vector<256x128xf32>
      %21 = arith.maximumf %19, %20 : vector<256x128xf32>
      %c0_15 = arith.constant 0 : index
      %c0_16 = arith.constant 0 : index
      %22 = vector.load %arg3[%c0_15, %c0_16] : memref<128x128xf32, #tpu.memory_space<vmem>>, vector<128x128xf32>
      %cst_17 = arith.constant dense<0.000000e+00> : vector<256x128xf32>
      %23 = tpu.matmul %21, %22, %cst_17 {dimension_numbers = #tpu.dot_dimension_numbers<[1], [0], [0], [1], [0, 0, 1, 1], [], []>} : vector<256x128xf32>, vector<128x128xf32>, vector<256x128xf32> -> vector<256x128xf32>
      %c0_18 = arith.constant 0 : index
      %c0_19 = arith.constant 0 : index
      %24 = vector.load %arg4[%c0_18, %c0_19] : memref<256x256xf32, #tpu.memory_space<vmem>>, vector<256x256xf32>
      %cst_20 = arith.constant dense<0.000000e+00> : vector<256x128xf32>
      %25 = tpu.matmul %24, %23, %cst_20 {dimension_numbers = #tpu.dot_dimension_numbers<[1], [0], [0], [1], [0, 0, 1, 1], [], []>} : vector<256x256xf32>, vector<256x128xf32>, vector<256x128xf32> -> vector<256x128xf32>
      %c0_21 = arith.constant 0 : index
      %c0_22 = arith.constant 0 : index
      %26 = vector.load %arg6[%c0_21, %c0_22] : memref<256x128xf32, #tpu.memory_space<vmem>>, vector<256x128xf32>
      tpu.vector_store %arg6[%c0_21, %c0_22], %25 {strides = array<i32>} : memref<256x128xf32, #tpu.memory_space<vmem>>, vector<256x128xf32>,
    } else {
    }
    %c128_i32 = arith.constant 128 : i32
    %3 = arith.muli %arg0, %c128_i32 : i32
    %4 = tpu.assume_multiple %3, 128 : i32
    %5 = arith.index_cast %4 : i32 to index
    %c0 = arith.constant 0 : index
    %6 = vector.load %arg6[%5, %c0] : memref<256x128xf32, #tpu.memory_space<vmem>>, vector<128x128xf32>
    %c0_1 = arith.constant 0 : index
    %c0_2 = arith.constant 0 : index
    %7 = vector.load %arg6[%c0_1, %c0_2] : memref<256x128xf32, #tpu.memory_space<vmem>>, vector<256x128xf32>
    %cst = arith.constant dense<0.000000e+00> : vector<128x256xf32>
    %8 = tpu.matmul %6, %7, %cst {dimension_numbers = #tpu.dot_dimension_numbers<[1], [1], [0], [0], [0, 0, 1, 0], [], []>} : vector<128x128xf32>, vector<256x128xf32>, vector<128x256xf32> -> vector<128x256xf32>
    %9 = arith.negf %8 : vector<128x256xf32>
    %10 = math.exp %9 : vector<128x256xf32>
    %cst_3 = arith.constant 1.000000e+00 : f32
    %11 = vector.broadcast %cst_3 : f32 to vector<128x256xf32>
    %12 = arith.addf %11, %10 : vector<128x256xf32>
    %13 = arith.divf %11, %12 : vector<128x256xf32>
    %c0_4 = arith.constant 0 : index
    %c0_5 = arith.constant 0 : index
    %14 = vector.load %arg5[%c0_4, %c0_5] : memref<128x256xf32, #tpu.memory_space<vmem>>, vector<128x256xf32>
    tpu.vector_store %arg5[%c0_4, %c0_5], %13 {strides = array<i32>} : memref<128x256xf32, #tpu.memory_space<vmem>>, vector<128x256xf32>,
    return
  }
  func.func @transform_0(%arg0: i32) -> (i32, i32) {
    %c0_i32 = arith.constant 0 : i32
    %c0_i32_0 = arith.constant 0 : i32
    %c0_i32_1 = arith.constant 0 : i32
    return %c0_i32, %c0_i32_0 : i32, i32
  }
  func.func @transform_1(%arg0: i32) -> (i32, i32) {
    %c0_i32 = arith.constant 0 : i32
    %c0_i32_0 = arith.constant 0 : i32
    %c0_i32_1 = arith.constant 0 : i32
    return %c0_i32, %c0_i32_0 : i32, i32
  }
  func.func @transform_2(%arg0: i32) -> (i32, i32) {
    %c0_i32 = arith.constant 0 : i32
    %c0_i32_0 = arith.constant 0 : i32
    %c0_i32_1 = arith.constant 0 : i32
    return %c0_i32, %c0_i32_0 : i32, i32
  }
  func.func @transform_3(%arg0: i32) -> (i32, i32) {
    %c0_i32 = arith.constant 0 : i32
    %c0_i32_0 = arith.constant 0 : i32
    %c0_i32_1 = arith.constant 0 : i32
    return %c0_i32, %c0_i32_0 : i32, i32
  }
  func.func @transform_4(%arg0: i32) -> (i32, i32) {
    %c0_i32 = arith.constant 0 : i32
    %c0_i32_0 = arith.constant 0 : i32
    return %arg0, %c0_i32 : i32, i32
  }
}

</mosaic_0001>

<bundles_post_ra>
// kernel: tpu_custom_call.1
= control target key start
LH: loop header
LB: loop body
LE: loop exit
PB: predicated region body
PF: predicated region fallthrough
CT: control target
= control target key end

     0   :  { %9 = vsyncpa [#allocation4], 0  ;;  %s3264_s0 = inlined_call_operand.hbm [shape: f32[256,128], index: 0, kind: input, shape index: {}]   ;;  %s3265_s1 = inlined_call_operand.hbm [shape: f32[128,128], index: 1, kind: input, shape index: {}]   ;;  %s3266_s2 = inlined_call_operand.hbm [shape: f32[128,128], index: 2, kind: input, shape index: {}]   ;;  %s3267_s3 = inlined_call_operand.hbm [shape: f32[256,256], index: 3, kind: input, shape index: {}]   ;;  %s3268_s4 = inlined_call_operand.hbm [shape: f32[256,256], index: 4, kind: output, shape index: {}]  }
   0x1   :  { %10 = vsyncpa [#allocation7], 0 }
   0x2   :  { %11 = vsyncpa [#allocation10], 0 }
   0x3   :  { %12 = vsyncpa [#allocation5], 0 }
   0x4   :  { %14 = vsyncpa [#allocation5 + $0x1], 0  ;;  %s2711_s15 = smov 0   ;;  %s2713_s16 = smov 0  }
   0x5   :  { %s2715_s17 = smov 0   ;;  %s2717_s18 = smov 0  }
   0x6 LB: > { %s2732_s19 = sadd.s32 4294967295, %s2672_s18   ;;  %s1875_s20 = sadd.s32 4294967294, %s2672_s18   ;;  %s2672_s18 = sphi %s2717_s18, %s3344_s18   ;;  %s2668_s17 = sphi %s2715_s17, %s3343_s17   ;;  %s2664_s16 = sphi %s2713_s16, %s3342_s16   ;;  %s2660_s15 = sphi %s2711_s15, %s3341_s15  }
   0x7   : > { %s2736_s21 = sadd.s32 1, %s2672_s18   ;;  %s111_s22 = sadd.s32 1, %s2668_s17 }
   0x8   : > { %s108_s23 = ssub.s32 %s2672_s18, %s2736_s21  ;;  %p121_p0 = scmp.ne.s32.totalorder %s2668_s17, %s2664_s16 }
   0x9   : > { %p109_p1 = scmp.eq.s32.totalorder %s108_s23, 0  ;;  %p122_p2 = scmp.eq.s32.totalorder %s2732_s19, 1 }
   0xa   : > { %p127_p3 = scmp.ne.s32.totalorder %s2664_s16, %s2660_s15  ;;  %p128_p4 = scmp.eq.s32.totalorder %s1875_s20, 1 }
   0xb   : > { %s2747_s24 = scalar_select %p109_p1, %s2668_s17, %s111_s22  }
   0xc   : > { %p2749_p5 = por %p122_p2, %p121_p0  ;;  %p2753_p6 = por %p128_p4, %p127_p3 }
   0xd   : > { %p1876_p7 = scmp.ge.s32.totalorder %s2672_s18, 1  ;;  %p135_p8 = scmp.lt.s32.totalorder %s2672_s18, 3 }
   0xe   : > { %s3291_s25 = scalar_select %p2749_p5, 1, 0 }
   0xf   : > { %s3292_s26 = scalar_select %p2753_p6, 1, 0 }
  0x10   : > { %p3269_p10 = scmp.eq.s32.totalorder %s2732_s19, 0  ;;  %p2761_p11 = pnand %p1876_p7, %p135_p8 }
  0x11   : > { %s2674_s28 = smov [#allocation6]   ;;  %s2675_s5 = smov [#allocation3]  }
  0x12   : > { %p2299_p12 = pneg %p2761_p11  ;;  %s160_s29 = sshll.u32 %s2674_s28, 4  ;;  %s161_s29 = int_to_ptr.vmem [resolvable:$true] %s160_s29 }
  0x13   : > { %s147_s6 = sshll.u32 %s2675_s5, 4  ;;  %s2676_s7 = smov [#allocation8]   ;;  %s148_s6 = int_to_ptr.vmem [resolvable:$true] %s147_s6 }
  0x14   : > { %p2769_p13 = pnand %p3269_p10, %p2299_p12  ;;  %s173_s8 = sshll.u32 %s2676_s7, 4  ;;  %s174_s8 = int_to_ptr.vmem [resolvable:$true] %s173_s8 }
  0x15   : > { %s2507_s9 = scalar_lea.vmem %s161_s29, 2048  ;;  %p2515_p4 = scmp.lt.s32.totalorder %s161_s29, %s161_s29 }
  0x16   : > { %p2498_p0 = pneg %p2769_p13  ;;  %p2508_p1 = scmp.ne.s32.totalorder %s161_s29, %s2507_s9 }
  0x17   : > { %p2516_p7 = scmp.lt.s32.totalorder %s2507_s9, %s2507_s9 }
  0x18   : > { %p2510_p2 = pnand %p2508_p1, %p2498_p0 }
  0x19   : > { %p2517_p8 = por %p2516_p7, %p2515_p4 }
  0x1a   : > { %p2511_p3 = pneg %p2510_p2 }
  0x1c   : > { %p2518_p12 = pnand %p2517_p8, %p2511_p3 }
  0x1e   : > { %2521 = shalt.err (!%p2518_p12)
}
  0x1f   : > { %s2677_s10 = smov 128   ;;  %s2678_s11 = smov 8  }
  0x20   : > { %2305 = dma.hbm_to_vmem [thread:$0]  (!%p2769_p13), %s3265_s1, 2048, %s161_s29, [#allocation7], %s2677_s10, %s2677_s10, %s2678_s11  }
  0x21   : > { %s2533_s14 = scalar_lea.vmem %s148_s6, 4096  ;;  %p2541_p10 = scmp.lt.s32.totalorder %s148_s6, %s148_s6 }
  0x22   : > { %p2534_p9 = scmp.ne.s32.totalorder %s148_s6, %s2533_s14  ;;  %p2542_p6 = scmp.lt.s32.totalorder %s2533_s14, %s2533_s14 }
  0x24   : > { %p2536_p1 = pnand %p2534_p9, %p2498_p0  ;;  %p2543_p4 = por %p2542_p6, %p2541_p10 }
  0x26   : > { %p2537_p2 = pneg %p2536_p1 }
  0x28   : > { %p2544_p3 = pnand %p2543_p4, %p2537_p2 }
  0x2a   : > { %2547 = shalt.err (!%p2544_p3)
}
  0x2b   : > { %2302 = dma.hbm_to_vmem [thread:$0]  (!%p2769_p13), %s3264_s0, 4096, %s148_s6, [#allocation4], %s2677_s10, %s2677_s10, %s2678_s11  }
  0x2c   : > { %s2559_s23 = scalar_lea.vmem %s174_s8, 2048  ;;  %p2567_p12 = scmp.lt.s32.totalorder %s174_s8, %s174_s8 }
  0x2d   : > { %p2560_p7 = scmp.ne.s32.totalorder %s174_s8, %s2559_s23  ;;  %p2568_p1 = scmp.lt.s32.totalorder %s2559_s23, %s2559_s23 }
  0x2f   : > { %p2562_p8 = pnand %p2560_p7, %p2498_p0  ;;  %p2569_p5 = por %p2568_p1, %p2567_p12 }
  0x31   : > { %p2563_p9 = pneg %p2562_p8 }
  0x33   : > { %p2570_p6 = pnand %p2569_p5, %p2563_p9 }
  0x35   : > { %2573 = shalt.err (!%p2570_p6)
}
  0x36   : > { %2308 = dma.hbm_to_vmem [thread:$0]  (!%p2769_p13), %s3266_s2, 2048, %s174_s8, [#allocation7], %s2677_s10, %s2677_s10, %s2678_s11  }
  0x37   : > { %s2679_s5 = smov [#allocation9]  }
  0x38   : > { %s186_s6 = sshll.u32 %s2679_s5, 4  ;;  %s187_s6 = int_to_ptr.vmem [resolvable:$true] %s186_s6 }
  0x39   : > { %s2585_s7 = scalar_lea.vmem %s187_s6, 8192  ;;  %p2593_p3 = scmp.lt.s32.totalorder %s187_s6, %s187_s6 }
  0x3a   : > { %p2586_p10 = scmp.ne.s32.totalorder %s187_s6, %s2585_s7  ;;  %p2594_p7 = scmp.lt.s32.totalorder %s2585_s7, %s2585_s7 }
  0x3c   : > { %p2588_p2 = pnand %p2586_p10, %p2498_p0  ;;  %p2595_p5 = por %p2594_p7, %p2593_p3 }
  0x3e   : > { %p2589_p4 = pneg %p2588_p2 }
  0x40   : > { %p2596_p8 = pnand %p2595_p5, %p2589_p4 }
  0x42   : > { %2599 = shalt.err (!%p2596_p8)
}
  0x43   : > { %s2680_s9 = smov 256   ;;  %s2681_s12 = smov 16  }
  0x44   : > { %2311 = dma.hbm_to_vmem [thread:$0]  (!%p2769_p13), %s3267_s3, 8192, %s187_s6, [#allocation10], %s2680_s9, %s2680_s9, %s2681_s12  }
  0x45   : > { %202 = sbr.rel (%p2761_p11) target bundleno = 1624 (0x658), region = 36  ;;  %p3295_p9 = scmp.eq.s32.totalorder (!%p2761_p11), %s2732_s19, 0 }
  0x4a   : > { %2643 = dma.done.wait (%p3295_p9), [#allocation4], 4096   ;;  %p3296_p0 = pmov %p3295_p9 }
  0x4c   : > { %2645 = vsyncadd (%p3296_p0), [#allocation4], 4294963200  ;;  %p3297_p12 = pmov %p3296_p0 }
  0x4d   : > { %p3298_p1 = pmov %p3296_p0 }
  0x4e   : > { %2647 = dma.done.wait (%p3297_p12), [#allocation7], 4096  }
  0x4f   : > { %2649 = vsyncadd (%p3298_p1), [#allocation7], 4294963200  ;;  %p3299_p6 = pmov %p3296_p0 }
  0x50   : > { %p3300_p13 = pmov %p3296_p0 }
  0x51   : > { %2651 = dma.done.wait (%p3299_p6), [#allocation10], 8192  }
  0x52   : > { %2653 = vsyncadd (%p3300_p13), [#allocation10], 4294959104  ;;  %s232_s27 = sand.u32 1, %s2664_s16   ;;  %p3301_p11 = scmp.ne.s32.totalorder %s2732_s19, 0 }
  0x53   : > { %s1886_s30 = sshll.u32 %s232_s27, 8 }
  0x54   : > { %s2824_s10 = scalar_lea.vmem [#allocation11], %s1886_s30  ;;  %239 = sbr.rel (%p3301_p11) target bundleno = 1268 (0x4f4), region = 56 }
  0x59   : > { %v287_v0 = vld [vmem:[#allocation6 + $0x78] sm:$0xff]  ;;  %v286_v1 = vld [vmem:[#allocation6 + $0x70] sm:$0xff]  ;;  %v285_v2 = vld [vmem:[#allocation6 + $0x68] sm:$0xff]  ;;  %v3271_v48 = vmov 0.0  }
  0x5a   : > { %2089 = vmatprep.subr.mxu1 %v287_v0  ;;  %v284_v3 = vld [vmem:[#allocation6 + $0x60] sm:$0xff]  ;;  %v283_v5 = vld [vmem:[#allocation6 + $0x58] sm:$0xff]  ;;  %v282_v6 = vld [vmem:[#allocation6 + $0x50] sm:$0xff] }
  0x5b   : > { %2090 = vmatpush3.msra.mxu1 %v287_v0  ;;  %v240_v4 = vld [vmem:[#allocation3] sm:$0xff]  ;;  %v281_v7 = vld [vmem:[#allocation6 + $0x48] sm:$0xff]  ;;  %v279_v9 = vld [vmem:[#allocation6 + $0x38] sm:$0xff] }
  0x5c   : > { %2091 = vmatprep.subr.mxu1 %v286_v1  ;;  %2121 = vmatprep.mubr.f32.mxu1 %v240_v4  ;;  %v280_v8 = vld [vmem:[#allocation6 + $0x40] sm:$0xff]  ;;  %v278_v10 = vld [vmem:[#allocation6 + $0x30] sm:$0xff]  ;;  %v277_v11 = vld [vmem:[#allocation6 + $0x28] sm:$0xff] }
  0x5d   : > { %2092 = vmatpush3.msra.mxu1 %v286_v1  ;;  %v276_v12 = vld [vmem:[#allocation6 + $0x20] sm:$0xff]  ;;  %v275_v13 = vld [vmem:[#allocation6 + $0x18] sm:$0xff]  ;;  %v274_v14 = vld [vmem:[#allocation6 + $0x10] sm:$0xff] }
  0x5e   : > { %2093 = vmatprep.subr.mxu1 %v285_v2  ;;  %v273_v15 = vld [vmem:[#allocation6 + $0x8] sm:$0xff]  ;;  %v272_v16 = vld [vmem:[#allocation6] sm:$0xff]  ;;  %v242_v18 = vld [vmem:[#allocation3 + $0x10] sm:$0xff] }
  0x5f   : > { %2094 = vmatpush3.msra.mxu1 %v285_v2  ;;  %v241_v17 = vld [vmem:[#allocation3 + $0x8] sm:$0xff]  ;;  %v243_v19 = vld [vmem:[#allocation3 + $0x18] sm:$0xff]  ;;  %v244_v20 = vld [vmem:[#allocation3 + $0x20] sm:$0xff] }
  0x60   : > { %2095 = vmatprep.subr.mxu1 %v284_v3  ;;  %v245_v21 = vld [vmem:[#allocation3 + $0x28] sm:$0xff]  ;;  %v246_v22 = vld [vmem:[#allocation3 + $0x30] sm:$0xff]  ;;  %v247_v23 = vld [vmem:[#allocation3 + $0x38] sm:$0xff] }
  0x61   : > { %2096 = vmatpush3.msra.mxu1 %v284_v3  ;;  %v248_v24 = vld [vmem:[#allocation3 + $0x40] sm:$0xff]  ;;  %v249_v25 = vld [vmem:[#allocation3 + $0x48] sm:$0xff]  ;;  %v250_v26 = vld [vmem:[#allocation3 + $0x50] sm:$0xff] }
  0x62   : > { %2097 = vmatprep.subr.mxu1 %v283_v5  ;;  %v251_v27 = vld [vmem:[#allocation3 + $0x58] sm:$0xff]  ;;  %v252_v28 = vld [vmem:[#allocation3 + $0x60] sm:$0xff]  ;;  %v253_v29 = vld [vmem:[#allocation3 + $0x68] sm:$0xff] }
  0x63   : > { %2098 = vmatpush3.msra.mxu1 %v283_v5  ;;  %v254_v30 = vld [vmem:[#allocation3 + $0x70] sm:$0xff]  ;;  %v255_v31 = vld [vmem:[#allocation3 + $0x78] sm:$0xff]  ;;  %v256_v32 = vld [vmem:[#allocation3 + $0x80] sm:$0xff] }
  0x64   : > { %2099 = vmatprep.subr.mxu1 %v282_v6  ;;  %v257_v33 = vld [vmem:[#allocation3 + $0x88] sm:$0xff]  ;;  %v258_v34 = vld [vmem:[#allocation3 + $0x90] sm:$0xff]  ;;  %v259_v35 = vld [vmem:[#allocation3 + $0x98] sm:$0xff] }
  0x65   : > { %2100 = vmatpush3.msra.mxu1 %v282_v6  ;;  %v260_v36 = vld [vmem:[#allocation3 + $0xa0] sm:$0xff]  ;;  %v261_v37 = vld [vmem:[#allocation3 + $0xa8] sm:$0xff]  ;;  %v262_v38 = vld [vmem:[#allocation3 + $0xb0] sm:$0xff] }
  0x66   : > { %2101 = vmatprep.subr.mxu1 %v281_v7  ;;  %v263_v39 = vld [vmem:[#allocation3 + $0xb8] sm:$0xff]  ;;  %v264_v40 = vld [vmem:[#allocation3 + $0xc0] sm:$0xff]  ;;  %v265_v41 = vld [vmem:[#allocation3 + $0xc8] sm:$0xff] }
  0x67   : > { %2102 = vmatpush3.msra.mxu1 %v281_v7  ;;  %v266_v42 = vld [vmem:[#allocation3 + $0xd0] sm:$0xff]  ;;  %v267_v43 = vld [vmem:[#allocation3 + $0xd8] sm:$0xff]  ;;  %v268_v44 = vld [vmem:[#allocation3 + $0xe0] sm:$0xff] }
  0x68   : > { %2103 = vmatprep.subr.mxu1 %v280_v8  ;;  %v269_v45 = vld [vmem:[#allocation3 + $0xe8] sm:$0xff]  ;;  %v270_v46 = vld [vmem:[#allocation3 + $0xf0] sm:$0xff]  ;;  %v271_v47 = vld [vmem:[#allocation3 + $0xf8] sm:$0xff] }
  0x69   : > { %2104 = vmatpush3.msra.mxu1 %v280_v8  ;;  %v2829_v49 = vld [vmem:[#allocation9 + $0x8] sm:$0xff] }
  0x6a   : > { %2105 = vmatprep.subr.mxu1 %v279_v9 }
  0x6b   : > { %2106 = vmatpush3.msra.mxu1 %v279_v9 }
  0x6c   : > { %2107 = vmatprep.subr.mxu1 %v278_v10 }
  0x6d   : > { %2108 = vmatpush3.msra.mxu1 %v278_v10 }
  0x6e   : > { %2109 = vmatprep.subr.mxu1 %v277_v11 }
  0x6f   : > { %2110 = vmatpush3.msra.mxu1 %v277_v11 }
  0x70   : > { %2111 = vmatprep.subr.mxu1 %v276_v12 }
  0x71   : > { %2112 = vmatpush3.msra.mxu1 %v276_v12 }
  0x72   : > { %2113 = vmatprep.subr.mxu1 %v275_v13 }
  0x73   : > { %2114 = vmatpush3.msra.mxu1 %v275_v13 }
  0x74   : > { %2115 = vmatprep.subr.mxu1 %v274_v14 }
  0x75   : > { %2116 = vmatpush3.msra.mxu1 %v274_v14 }
  0x76   : > { %2117 = vmatprep.subr.mxu1 %v273_v15 }
  0x77   : > { %2118 = vmatpush3.msra.mxu1 %v273_v15 }
  0x78   : > { %2119 = vmatprep.subr.mxu1 %v272_v16 }
  0x79   : > { %2120 = vmatpush3.msra.mxu1 %v272_v16 }
  0x7a   : > { %2122 = vmatmul.mubr.f32.vlgmr.msra.gmra.mxu1 %v241_v17  ;;  %577 = vmatprep.subr.mxu1 %v3271_v48 }
  0x7b   : > { %2124 = vmatprep.mubr.f32.mxu1 %v242_v18  ;;  %v849_v18 = vld [vmem:[#allocation8 + $0x78] sm:$0xff] }
  0x7c   : > { %2169 = vmatprep.subr.mxu0 %v849_v18 }
  0x7d   : > { %2170 = vmatpush3.msra.mxu0 %v849_v18  ;;  %v3008_v18 = vld [vmem:[#allocation9 + $0x170] sm:$0xff] }
  0x7e   : > { %2125 = vmatmul.mubr.f32.gmra.mxu1 %v243_v19  ;;  %v848_v19 = vld [vmem:[#allocation8 + $0x70] sm:$0xff]  ;;  %3303 = vst [vmem:[#allocation17_spill] sm:$0xff] %v3008_v18 }
  0x7f   : > { %2127 = vmatprep.mubr.f32.mxu1 %v244_v20  ;;  %v2867_v20 = vld [vmem:[#allocation9] sm:$0xff]  ;;  %2171 = vmatprep.subr.mxu0 %v848_v19 }
  0x80   : > { %2172 = vmatpush3.msra.mxu0 %v848_v19  ;;  %v3010_v19 = vld [vmem:[#allocation9 + $0x188] sm:$0xff] }
  0x81   : > { %3304 = vst [vmem:[#allocation18_spill] sm:$0xff] %v3010_v19 }
  0x82   : > { %2128 = vmatmul.mubr.f32.gmra.mxu1 %v245_v21  ;;  %v2870_v21 = vld [vmem:[#allocation9 + $0x18] sm:$0xff] }
  0x83   : > { %2130 = vmatprep.mubr.f32.mxu1 %v246_v22  ;;  %v847_v22 = vld [vmem:[#allocation8 + $0x68] sm:$0xff] }
  0x84   : > { %2173 = vmatprep.subr.mxu0 %v847_v22 }
  0x85   : > { %2174 = vmatpush3.msra.mxu0 %v847_v22  ;;  %v3014_v22 = vld [vmem:[#allocation9 + $0x180] sm:$0xff] }
  0x86   : > { %2131 = vmatmul.mubr.f32.gmra.mxu1 %v247_v23  ;;  %v846_v23 = vld [vmem:[#allocation8 + $0x60] sm:$0xff]  ;;  %3305 = vst [vmem:[#allocation19_spill] sm:$0xff] %v3014_v22 }
  0x87   : > { %2133 = vmatprep.mubr.f32.mxu1 %v248_v24  ;;  %v2875_v24 = vld [vmem:[#allocation9 + $0x10] sm:$0xff]  ;;  %2175 = vmatprep.subr.mxu0 %v846_v23 }
  0x88   : > { %2176 = vmatpush3.msra.mxu0 %v846_v23  ;;  %v3016_v23 = vld [vmem:[#allocation9 + $0x198] sm:$0xff] }
  0x89   : > { %3306 = vst [vmem:[#allocation20_spill] sm:$0xff] %v3016_v23 }
  0x8a   : > { %2134 = vmatmul.mubr.f32.gmra.mxu1 %v249_v25  ;;  %v2877_v25 = vld [vmem:[#allocation9 + $0x28] sm:$0xff] }
  0x8b   : > { %2136 = vmatprep.mubr.f32.mxu1 %v250_v26  ;;  %v845_v26 = vld [vmem:[#allocation8 + $0x58] sm:$0xff] }
  0x8c   : > { %2177 = vmatprep.subr.mxu0 %v845_v26 }
  0x8d   : > { %2178 = vmatpush3.msra.mxu0 %v845_v26  ;;  %v3020_v26 = vld [vmem:[#allocation9 + $0x190] sm:$0xff] }
  0x8e   : > { %2137 = vmatmul.mubr.f32.gmra.mxu1 %v251_v27  ;;  %v844_v27 = vld [vmem:[#allocation8 + $0x50] sm:$0xff]  ;;  %3307 = vst [vmem:[#allocation21_spill] sm:$0xff] %v3020_v26 }
  0x8f   : > { %2139 = vmatprep.mubr.f32.mxu1 %v252_v28  ;;  %v2881_v28 = vld [vmem:[#allocation9 + $0x20] sm:$0xff]  ;;  %2179 = vmatprep.subr.mxu0 %v844_v27 }
  0x90   : > { %2180 = vmatpush3.msra.mxu0 %v844_v27  ;;  %v3022_v27 = vld [vmem:[#allocation9 + $0x1a8] sm:$0xff] }
  0x91   : > { %3308 = vst [vmem:[#allocation22_spill] sm:$0xff] %v3022_v27 }
  0x92   : > { %2140 = vmatmul.mubr.f32.gmra.mxu1 %v253_v29  ;;  %v2883_v29 = vld [vmem:[#allocation9 + $0x38] sm:$0xff] }
  0x93   : > { %2142 = vmatprep.mubr.f32.mxu1 %v254_v30  ;;  %v843_v30 = vld [vmem:[#allocation8 + $0x48] sm:$0xff] }
  0x94   : > { %2181 = vmatprep.subr.mxu0 %v843_v30 }
  0x95   : > { %2182 = vmatpush3.msra.mxu0 %v843_v30  ;;  %v3026_v30 = vld [vmem:[#allocation9 + $0x1a0] sm:$0xff] }
  0x96   : > { %2143 = vmatmul.mubr.f32.gmra.mxu1 %v255_v31  ;;  %v842_v31 = vld [vmem:[#allocation8 + $0x40] sm:$0xff]  ;;  %3309 = vst [vmem:[#allocation23_spill] sm:$0xff] %v3026_v30 }
  0x97   : > { %2145 = vmatprep.mubr.f32.mxu1 %v256_v32  ;;  %v2887_v32 = vld [vmem:[#allocation9 + $0x30] sm:$0xff]  ;;  %2183 = vmatprep.subr.mxu0 %v842_v31 }
  0x98   : > { %2184 = vmatpush3.msra.mxu0 %v842_v31  ;;  %v3028_v31 = vld [vmem:[#allocation9 + $0x1b8] sm:$0xff] }
  0x99   : > { %3310 = vst [vmem:[#allocation24_spill] sm:$0xff] %v3028_v31 }
  0x9a   : > { %2146 = vmatmul.mubr.f32.gmra.mxu1 %v257_v33  ;;  %v2889_v33 = vld [vmem:[#allocation9 + $0x48] sm:$0xff] }
  0x9b   : > { %2148 = vmatprep.mubr.f32.mxu1 %v258_v34  ;;  %v841_v34 = vld [vmem:[#allocation8 + $0x38] sm:$0xff] }
  0x9c   : > { %2185 = vmatprep.subr.mxu0 %v841_v34 }
  0x9d   : > { %2186 = vmatpush3.msra.mxu0 %v841_v34  ;;  %v3032_v34 = vld [vmem:[#allocation9 + $0x1b0] sm:$0xff] }
  0x9e   : > { %2149 = vmatmul.mubr.f32.gmra.mxu1 %v259_v35  ;;  %v840_v35 = vld [vmem:[#allocation8 + $0x30] sm:$0xff]  ;;  %3311 = vst [vmem:[#allocation25_spill] sm:$0xff] %v3032_v34 }
  0x9f   : > { %2151 = vmatprep.mubr.f32.mxu1 %v260_v36  ;;  %v2893_v36 = vld [vmem:[#allocation9 + $0x40] sm:$0xff]  ;;  %2187 = vmatprep.subr.mxu0 %v840_v35 }
  0xa0   : > { %2188 = vmatpush3.msra.mxu0 %v840_v35  ;;  %v3034_v35 = vld [vmem:[#allocation9 + $0x1c8] sm:$0xff] }
  0xa1   : > { %3312 = vst [vmem:[#allocation26_spill] sm:$0xff] %v3034_v35 }
  0xa2   : > { %2152 = vmatmul.mubr.f32.gmra.mxu1 %v261_v37  ;;  %v2895_v37 = vld [vmem:[#allocation9 + $0x58] sm:$0xff] }
  0xa3   : > { %2154 = vmatprep.mubr.f32.mxu1 %v262_v38  ;;  %v839_v38 = vld [vmem:[#allocation8 + $0x28] sm:$0xff] }
  0xa4   : > { %2189 = vmatprep.subr.mxu0 %v839_v38 }
  0xa5   : > { %2190 = vmatpush3.msra.mxu0 %v839_v38  ;;  %v3038_v38 = vld [vmem:[#allocation9 + $0x1c0] sm:$0xff] }
  0xa6   : > { %2155 = vmatmul.mubr.f32.gmra.mxu1 %v263_v39  ;;  %v838_v39 = vld [vmem:[#allocation8 + $0x20] sm:$0xff]  ;;  %3313 = vst [vmem:[#allocation27_spill] sm:$0xff] %v3038_v38 }
  0xa7   : > { %2157 = vmatprep.mubr.f32.mxu1 %v264_v40  ;;  %v2899_v40 = vld [vmem:[#allocation9 + $0x50] sm:$0xff]  ;;  %2191 = vmatprep.subr.mxu0 %v838_v39 }
  0xa8   : > { %2192 = vmatpush3.msra.mxu0 %v838_v39  ;;  %v3040_v39 = vld [vmem:[#allocation9 + $0x1d8] sm:$0xff] }
  0xa9   : > { %3314 = vst [vmem:[#allocation28_spill] sm:$0xff] %v3040_v39 }
  0xaa   : > { %2158 = vmatmul.mubr.f32.gmra.mxu1 %v265_v41  ;;  %v2901_v41 = vld [vmem:[#allocation9 + $0x68] sm:$0xff] }
  0xab   : > { %2160 = vmatprep.mubr.f32.mxu1 %v266_v42  ;;  %v837_v42 = vld [vmem:[#allocation8 + $0x18] sm:$0xff] }
  0xac   : > { %2193 = vmatprep.subr.mxu0 %v837_v42 }
  0xad   : > { %2194 = vmatpush3.msra.mxu0 %v837_v42  ;;  %v3044_v42 = vld [vmem:[#allocation9 + $0x1d0] sm:$0xff] }
  0xae   : > { %2161 = vmatmul.mubr.f32.gmra.mxu1 %v267_v43  ;;  %v2905_v43 = vld [vmem:[#allocation9 + $0x60] sm:$0xff]  ;;  %3315 = vst [vmem:[#allocation29_spill] sm:$0xff] %v3044_v42 }
  0xaf   : > { %2163 = vmatprep.mubr.f32.mxu1 %v268_v44  ;;  %v2907_v44 = vld [vmem:[#allocation9 + $0x78] sm:$0xff] }
  0xb2   : > { %2164 = vmatmul.mubr.f32.gmra.mxu1 %v269_v45  ;;  %v2911_v45 = vld [vmem:[#allocation9 + $0x70] sm:$0xff] }
  0xb3   : > { %2166 = vmatprep.mubr.f32.mxu1 %v270_v46  ;;  %v2913_v46 = vld [vmem:[#allocation9 + $0x88] sm:$0xff] }
  0xb6   : > { %2167 = vmatmul.mubr.f32.gmra.mxu1 %v271_v47  ;;  %v2917_v47 = vld [vmem:[#allocation9 + $0x80] sm:$0xff] }
  0xb7   : > { %641 = vmatprep.mubr.f32.mxu1 %v2829_v49 }
 0x13a   : > { %v2123_v50 = vpop.f32.mrf.mxu1 }
 0x13c   : > { %v354_v51 = vpop.f32.mrf.mxu1 }
 0x13e   : > { %v2126_v52 = vpop.f32.mrf.mxu1 }
 0x140   : > { %v364_v53 = vpop.f32.mrf.mxu1 }
 0x142   : > { %v2129_v54 = vpop.f32.mrf.mxu1 }
 0x144   : > { %v374_v55 = vpop.f32.mrf.mxu1 }
 0x146   : > { %v2132_v56 = vpop.f32.mrf.mxu1 }
 0x148   : > { %v384_v57 = vpop.f32.mrf.mxu1 }
 0x14a   : > { %v2135_v58 = vpop.f32.mrf.mxu1 }
 0x14c   : > { %v394_v59 = vpop.f32.mrf.mxu1 }
 0x14e   : > { %v2138_v60 = vpop.f32.mrf.mxu1 }
 0x150   : > { %v404_v61 = vpop.f32.mrf.mxu1 }
 0x152   : > { %v2141_v62 = vpop.f32.mrf.mxu1 }
 0x154   : > { %v414_v63 = vpop.f32.mrf.mxu1 }
 0x156   : > { %v2144_v0 = vpop.f32.mrf.mxu1 }
 0x157   : > { %578 = vmatpush1.msra.mxu1 %v2144_v0  ;;  %v2961_v0 = vld [vmem:[#allocation9 + $0x108] sm:$0xff] }
 0x158   : > { %v424_v1 = vpop.f32.mrf.mxu1  ;;  %579 = vmatprep.subr.mxu1 %v3271_v48 }
 0x159   : > { %580 = vmatpush1.msra.mxu1 %v424_v1  ;;  %v2965_v1 = vld [vmem:[#allocation9 + $0x100] sm:$0xff] }
 0x15a   : > { %v2833_v2 = vpop.f32.mrf.mxu1  ;;  %581 = vmatprep.subr.mxu1 %v3271_v48 }
 0x15b   : > { %582 = vmatpush1.msra.mxu1 %v2141_v62  ;;  %v2955_v62 = vld [vmem:[#allocation9 + $0xf8] sm:$0xff] }
 0x15c   : > { %v2836_v3 = vpop.f32.mrf.mxu1  ;;  %583 = vmatprep.subr.mxu1 %v3271_v48 }
 0x15d   : > { %584 = vmatpush1.msra.mxu1 %v414_v63  ;;  %v2959_v63 = vld [vmem:[#allocation9 + $0xf0] sm:$0xff] }
 0x15e   : > { %v2150_v4 = vpop.f32.mrf.mxu1  ;;  %585 = vmatprep.subr.mxu1 %v3271_v48 }
 0x15f   : > { %586 = vmatpush1.msra.mxu1 %v2138_v60  ;;  %v2949_v60 = vld [vmem:[#allocation9 + $0xe8] sm:$0xff] }
 0x160   : > { %v444_v5 = vpop.f32.mrf.mxu1  ;;  %587 = vmatprep.subr.mxu1 %v3271_v48 }
 0x161   : > { %588 = vmatpush1.msra.mxu1 %v404_v61  ;;  %v2953_v61 = vld [vmem:[#allocation9 + $0xe0] sm:$0xff] }
 0x162   : > { %v2153_v6 = vpop.f32.mrf.mxu1  ;;  %589 = vmatprep.subr.mxu1 %v3271_v48 }
 0x163   : > { %590 = vmatpush1.msra.mxu1 %v2135_v58  ;;  %v2943_v58 = vld [vmem:[#allocation9 + $0xd8] sm:$0xff] }
 0x164   : > { %v454_v7 = vpop.f32.mrf.mxu1  ;;  %591 = vmatprep.subr.mxu1 %v3271_v48 }
 0x165   : > { %592 = vmatpush1.msra.mxu1 %v394_v59  ;;  %v2947_v59 = vld [vmem:[#allocation9 + $0xd0] sm:$0xff] }
 0x166   : > { %v2156_v8 = vpop.f32.mrf.mxu1  ;;  %593 = vmatprep.subr.mxu1 %v3271_v48 }
 0x167   : > { %594 = vmatpush1.msra.mxu1 %v2132_v56  ;;  %v2937_v56 = vld [vmem:[#allocation9 + $0xc8] sm:$0xff] }
 0x168   : > { %v464_v9 = vpop.f32.mrf.mxu1  ;;  %595 = vmatprep.subr.mxu1 %v3271_v48 }
 0x169   : > { %596 = vmatpush1.msra.mxu1 %v384_v57  ;;  %v2941_v57 = vld [vmem:[#allocation9 + $0xc0] sm:$0xff] }
 0x16a   : > { %v2159_v10 = vpop.f32.mrf.mxu1  ;;  %597 = vmatprep.subr.mxu1 %v3271_v48 }
 0x16b   : > { %598 = vmatpush1.msra.mxu1 %v2129_v54  ;;  %v2931_v54 = vld [vmem:[#allocation9 + $0xb8] sm:$0xff] }
 0x16c   : > { %v474_v11 = vpop.f32.mrf.mxu1  ;;  %599 = vmatprep.subr.mxu1 %v3271_v48 }
 0x16d   : > { %600 = vmatpush1.msra.mxu1 %v374_v55  ;;  %v2935_v55 = vld [vmem:[#allocation9 + $0xb0] sm:$0xff] }
 0x16e   : > { %v2162_v12 = vpop.f32.mrf.mxu1  ;;  %601 = vmatprep.subr.mxu1 %v3271_v48 }
 0x16f   : > { %602 = vmatpush1.msra.mxu1 %v2126_v52  ;;  %v2925_v52 = vld [vmem:[#allocation9 + $0xa8] sm:$0xff] }
 0x170   : > { %v484_v13 = vpop.f32.mrf.mxu1  ;;  %603 = vmatprep.subr.mxu1 %v3271_v48 }
 0x171   : > { %604 = vmatpush1.msra.mxu1 %v364_v53  ;;  %v2929_v53 = vld [vmem:[#allocation9 + $0xa0] sm:$0xff] }
 0x172   : > { %v2165_v14 = vpop.f32.mrf.mxu1  ;;  %605 = vmatprep.subr.mxu1 %v3271_v48 }
 0x173   : > { %606 = vmatpush1.msra.mxu1 %v2123_v50  ;;  %v2919_v50 = vld [vmem:[#allocation9 + $0x98] sm:$0xff] }
 0x174   : > { %v494_v15 = vpop.f32.mrf.mxu1  ;;  %607 = vmatprep.subr.mxu1 %v3271_v48 }
 0x175   : > { %608 = vmatpush1.msra.mxu1 %v354_v51  ;;  %v2923_v51 = vld [vmem:[#allocation9 + $0x90] sm:$0xff] }
 0x176   : > { %v2168_v16 = vpop.f32.mrf.mxu1  ;;  %609 = vmatprep.subr.mxu1 %v3271_v48 }
 0x177   : > { %610 = vmatpush2.msra.mxu1 %v2168_v16  ;;  %v3002_v16 = vld [vmem:[#allocation9 + $0x160] sm:$0xff] }
 0x178   : > { %v504_v17 = vpop.f32.mrf.mxu1  ;;  %611 = vmatprep.subr.mxu1 %v3271_v48 }
 0x179   : > { %612 = vmatpush2.msra.mxu1 %v504_v17  ;;  %v3004_v17 = vld [vmem:[#allocation9 + $0x178] sm:$0xff] }
 0x17a   : > { %613 = vmatprep.subr.mxu1 %v3271_v48  ;;  %3302 = vst [vmem:[#allocation16_spill] sm:$0xff] %v3004_v17 }
 0x17b   : > { %614 = vmatpush2.msra.mxu1 %v2165_v14  ;;  %v2996_v14 = vld [vmem:[#allocation9 + $0x150] sm:$0xff] }
 0x17c   : > { %615 = vmatprep.subr.mxu1 %v3271_v48 }
 0x17d   : > { %616 = vmatpush2.msra.mxu1 %v494_v15  ;;  %v2998_v15 = vld [vmem:[#allocation9 + $0x168] sm:$0xff] }
 0x17e   : > { %617 = vmatprep.subr.mxu1 %v3271_v48 }
 0x17f   : > { %618 = vmatpush2.msra.mxu1 %v2162_v12  ;;  %v2990_v12 = vld [vmem:[#allocation9 + $0x140] sm:$0xff] }
 0x180   : > { %619 = vmatprep.subr.mxu1 %v3271_v48 }
 0x181   : > { %620 = vmatpush2.msra.mxu1 %v484_v13  ;;  %v2992_v13 = vld [vmem:[#allocation9 + $0x158] sm:$0xff] }
 0x182   : > { %621 = vmatprep.subr.mxu1 %v3271_v48 }
 0x183   : > { %622 = vmatpush2.msra.mxu1 %v2159_v10  ;;  %v2984_v10 = vld [vmem:[#allocation9 + $0x130] sm:$0xff] }
 0x184   : > { %623 = vmatprep.subr.mxu1 %v3271_v48 }
 0x185   : > { %624 = vmatpush2.msra.mxu1 %v474_v11  ;;  %v2986_v11 = vld [vmem:[#allocation9 + $0x148] sm:$0xff] }
 0x186   : > { %625 = vmatprep.subr.mxu1 %v3271_v48 }
 0x187   : > { %626 = vmatpush2.msra.mxu1 %v2156_v8  ;;  %v2977_v8 = vld [vmem:[#allocation9 + $0x120] sm:$0xff] }
 0x188   : > { %627 = vmatprep.subr.mxu1 %v3271_v48 }
 0x189   : > { %628 = vmatpush2.msra.mxu1 %v464_v9  ;;  %v2979_v9 = vld [vmem:[#allocation9 + $0x138] sm:$0xff] }
 0x18a   : > { %629 = vmatprep.subr.mxu1 %v3271_v48 }
 0x18b   : > { %630 = vmatpush2.msra.mxu1 %v2153_v6  ;;  %v835_v6 = vld [vmem:[#allocation8 + $0x8] sm:$0xff] }
 0x18c   : > { %631 = vmatprep.subr.mxu1 %v3271_v48 }
 0x18d   : > { %632 = vmatpush2.msra.mxu1 %v454_v7  ;;  %v834_v7 = vld [vmem:[#allocation8] sm:$0xff] }
 0x18e   : > { %633 = vmatprep.subr.mxu1 %v3271_v48 }
 0x18f   : > { %634 = vmatpush2.msra.mxu1 %v2150_v4  ;;  %v2971_v4 = vld [vmem:[#allocation9 + $0x110] sm:$0xff] }
 0x190   : > { %635 = vmatprep.subr.mxu1 %v3271_v48 }
 0x191   : > { %636 = vmatpush2.msra.mxu1 %v444_v5  ;;  %v2973_v5 = vld [vmem:[#allocation9 + $0x128] sm:$0xff] }
 0x192   : > { %637 = vmatprep.subr.mxu1 %v3271_v48 }
 0x193   : > { %638 = vmatpush2.msra.mxu1 %v2833_v2  ;;  %v2967_v2 = vld [vmem:[#allocation9 + $0x118] sm:$0xff] }
 0x194   : > { %639 = vmatprep.subr.mxu1 %v3271_v48 }
 0x195   : > { %640 = vmatpush2.msra.mxu1 %v2836_v3  ;;  %v836_v3 = vld [vmem:[#allocation8 + $0x10] sm:$0xff] }
 0x196   : > { %642 = vmatmul.mubr.f32.vlgmr.msra.gmra.mxu1 %v2867_v20  ;;  %2195 = vmatprep.subr.mxu0 %v836_v3 }
 0x197   : > { %646 = vmatprep.mubr.f32.mxu1 %v2870_v21  ;;  %2196 = vmatpush3.msra.mxu0 %v836_v3  ;;  %v3046_v3 = vld [vmem:[#allocation9 + $0x1e8] sm:$0xff] }
 0x198   : > { %2197 = vmatprep.subr.mxu0 %v835_v6  ;;  %3316 = vst [vmem:[#allocation30_spill] sm:$0xff] %v3046_v3 }
 0x199   : > { %2198 = vmatpush3.msra.mxu0 %v835_v6  ;;  %v3050_v6 = vld [vmem:[#allocation9 + $0x1e0] sm:$0xff] }
 0x19a   : > { %647 = vmatmul.mubr.f32.gmra.mxu1 %v2875_v24  ;;  %2199 = vmatprep.subr.mxu0 %v834_v7  ;;  %3317 = vst [vmem:[#allocation31_spill] sm:$0xff] %v3050_v6 }
 0x19b   : > { %651 = vmatprep.mubr.f32.mxu1 %v2877_v25  ;;  %2200 = vmatpush3.msra.mxu0 %v834_v7  ;;  %v3052_v7 = vld [vmem:[#allocation9 + $0x1f8] sm:$0xff] }
 0x19c   : > { %1075 = vmatprep.subr.mxu0 %v3271_v48  ;;  %3318 = vst [vmem:[#allocation32_spill] sm:$0xff] %v3052_v7  ;;  %v3056_v48 = vld [vmem:[#allocation9 + $0x1f0] sm:$0xff] }
 0x19d   : > { %3319 = vst [vmem:[#allocation33_spill] sm:$0xff] %v3056_v48 }
 0x19e   : > { %652 = vmatmul.mubr.f32.gmra.mxu1 %v2881_v28 }
 0x19f   : > { %656 = vmatprep.mubr.f32.mxu1 %v2883_v29 }
 0x1a2   : > { %657 = vmatmul.mubr.f32.gmra.mxu1 %v2887_v32 }
 0x1a3   : > { %661 = vmatprep.mubr.f32.mxu1 %v2889_v33 }
 0x1a6   : > { %662 = vmatmul.mubr.f32.gmra.mxu1 %v2893_v36 }
 0x1a7   : > { %666 = vmatprep.mubr.f32.mxu1 %v2895_v37 }
 0x1aa   : > { %667 = vmatmul.mubr.f32.gmra.mxu1 %v2899_v40 }
 0x1ab   : > { %671 = vmatprep.mubr.f32.mxu1 %v2901_v41 }
 0x1ae   : > { %672 = vmatmul.mubr.f32.gmra.mxu1 %v2905_v43 }
 0x1af   : > { %676 = vmatprep.mubr.f32.mxu1 %v2907_v44 }
 0x1b2   : > { %677 = vmatmul.mubr.f32.gmra.mxu1 %v2911_v45 }
 0x1b3   : > { %681 = vmatprep.mubr.f32.mxu1 %v2913_v46 }
 0x1b6   : > { %682 = vmatmul.mubr.f32.gmra.mxu1 %v2917_v47 }
 0x1b7   : > { %686 = vmatprep.mubr.f32.mxu1 %v2919_v50 }
 0x1ba   : > { %687 = vmatmul.mubr.f32.gmra.mxu1 %v2923_v51 }
 0x1bb   : > { %691 = vmatprep.mubr.f32.mxu1 %v2925_v52 }
 0x1be   : > { %692 = vmatmul.mubr.f32.gmra.mxu1 %v2929_v53 }
 0x1bf   : > { %696 = vmatprep.mubr.f32.mxu1 %v2931_v54 }
 0x1c2   : > { %697 = vmatmul.mubr.f32.gmra.mxu1 %v2935_v55 }
 0x1c3   : > { %701 = vmatprep.mubr.f32.mxu1 %v2937_v56 }
 0x1c6   : > { %702 = vmatmul.mubr.f32.gmra.mxu1 %v2941_v57 }
 0x1c7   : > { %706 = vmatprep.mubr.f32.mxu1 %v2943_v58 }
 0x1ca   : > { %707 = vmatmul.mubr.f32.gmra.mxu1 %v2947_v59 }
 0x1cb   : > { %711 = vmatprep.mubr.f32.mxu1 %v2949_v60 }
 0x1ce   : > { %712 = vmatmul.mubr.f32.gmra.mxu1 %v2953_v61 }
 0x1cf   : > { %716 = vmatprep.mubr.f32.mxu1 %v2955_v62 }
 0x1d2   : > { %717 = vmatmul.mubr.f32.gmra.mxu1 %v2959_v63 }
 0x1d3   : > { %721 = vmatprep.mubr.f32.mxu1 %v2961_v0 }
 0x1d6   : > { %722 = vmatmul.mubr.f32.gmra.mxu1 %v2965_v1 }
 0x1d7   : > { %726 = vmatprep.mubr.f32.mxu1 %v2967_v2 }
 0x1da   : > { %727 = vmatmul.mubr.f32.gmra.mxu1 %v2971_v4 }
 0x1db   : > { %731 = vmatprep.mubr.f32.mxu1 %v2973_v5 }
 0x1de   : > { %732 = vmatmul.mubr.f32.gmra.mxu1 %v2977_v8 }
 0x1df   : > { %736 = vmatprep.mubr.f32.mxu1 %v2979_v9 }
 0x1e2   : > { %737 = vmatmul.mubr.f32.gmra.mxu1 %v2984_v10 }
 0x1e3   : > { %741 = vmatprep.mubr.f32.mxu1 %v2986_v11 }
 0x1e6   : > { %742 = vmatmul.mubr.f32.gmra.mxu1 %v2990_v12 }
 0x1e7   : > { %746 = vmatprep.mubr.f32.mxu1 %v2992_v13 }
 0x1ea   : > { %747 = vmatmul.mubr.f32.gmra.mxu1 %v2996_v14 }
 0x1eb   : > { %751 = vmatprep.mubr.f32.mxu1 %v2998_v15 }
 0x1ee   : > { %752 = vmatmul.mubr.f32.gmra.mxu1 %v3002_v16 }
 0x1ef   : > { %756 = vmatprep.mubr.f32.mxu1 %v3004_v17 }
 0x1f2   : > { %757 = vmatmul.mubr.f32.gmra.mxu1 %v3008_v18 }
 0x1f3   : > { %761 = vmatprep.mubr.f32.mxu1 %v3010_v19 }
 0x1f6   : > { %762 = vmatmul.mubr.f32.gmra.mxu1 %v3014_v22 }
 0x1f7   : > { %766 = vmatprep.mubr.f32.mxu1 %v3016_v23 }
 0x1fa   : > { %767 = vmatmul.mubr.f32.gmra.mxu1 %v3020_v26 }
 0x1fb   : > { %771 = vmatprep.mubr.f32.mxu1 %v3022_v27 }
 0x1fe   : > { %772 = vmatmul.mubr.f32.gmra.mxu1 %v3026_v30 }
 0x1ff   : > { %776 = vmatprep.mubr.f32.mxu1 %v3028_v31 }
 0x202   : > { %777 = vmatmul.mubr.f32.gmra.mxu1 %v3032_v34 }
 0x203   : > { %781 = vmatprep.mubr.f32.mxu1 %v3034_v35 }
 0x206   : > { %782 = vmatmul.mubr.f32.gmra.mxu1 %v3038_v38 }
 0x207   : > { %786 = vmatprep.mubr.f32.mxu1 %v3040_v39 }
 0x20a   : > { %787 = vmatmul.mubr.f32.gmra.mxu1 %v3044_v42 }
 0x20b   : > { %791 = vmatprep.mubr.f32.mxu1 %v3046_v3 }
 0x20e   : > { %792 = vmatmul.mubr.f32.gmra.mxu1 %v3050_v6 }
 0x20f   : > { %796 = vmatprep.mubr.f32.mxu1 %v3052_v7 }
 0x212   : > { %797 = vmatmul.mubr.f32.gmra.mxu1 %v3056_v48 }
 0x256   : > { %v643_v39 = vpop.f32.mrf.mxu1 }
 0x257   : > { %v802_v38 = vmax.f32 %v643_v39, 0.0 }
 0x258   : > { %v645_v35 = vpop.f32.mrf.mxu1 }
 0x259   : > { %2201 = vmatprep.mubr.f32.mxu0 %v802_v38 }
 0x25a   : > { %v648_v34 = vpop.f32.mrf.mxu1 }
 0x25b   : > { %v803_v42 = vmax.f32 %v648_v34, 0.0 }
 0x25c   : > { %v650_v31 = vpop.f32.mrf.mxu1 }
 0x25d   : > { %2202 = vmatmul.mubr.f32.vlgmr.msra.gmra.mxu0 %v803_v42 }
 0x25e   : > { %v653_v3 = vpop.f32.mrf.mxu1 }
 0x25f   : > { %v804_v30 = vmax.f32 %v653_v3, 0.0 }
 0x260   : > { %v655_v27 = vpop.f32.mrf.mxu1 }
 0x261   : > { %2204 = vmatprep.mubr.f32.mxu0 %v804_v30 }
 0x262   : > { %v658_v26 = vpop.f32.mrf.mxu1 }
 0x263   : > { %v805_v6 = vmax.f32 %v658_v26, 0.0 }
 0x264   : > { %v660_v23 = vpop.f32.mrf.mxu1 }
 0x265   : > { %2205 = vmatmul.mubr.f32.gmra.mxu0 %v805_v6 }
 0x266   : > { %v663_v7 = vpop.f32.mrf.mxu1 }
 0x267   : > { %v806_v22 = vmax.f32 %v663_v7, 0.0 }
 0x268   : > { %v665_v19 = vpop.f32.mrf.mxu1 }
 0x269   : > { %2207 = vmatprep.mubr.f32.mxu0 %v806_v22 }
 0x26a   : > { %v668_v48 = vpop.f32.mrf.mxu1 }
 0x26b   : > { %v807_v39 = vmax.f32 %v668_v48, 0.0 }
 0x26c   : > { %v670_v35 = vpop.f32.mrf.mxu1 }
 0x26d   : > { %2208 = vmatmul.mubr.f32.gmra.mxu0 %v807_v39 }
 0x26e   : > { %v673_v38 = vpop.f32.mrf.mxu1 }
 0x26f   : > { %v808_v34 = vmax.f32 %v673_v38, 0.0 }
 0x270   : > { %v675_v31 = vpop.f32.mrf.mxu1 }
 0x271   : > { %2210 = vmatprep.mubr.f32.mxu0 %v808_v34 }
 0x272   : > { %v678_v42 = vpop.f32.mrf.mxu1 }
 0x273   : > { %v809_v3 = vmax.f32 %v678_v42, 0.0 }
 0x274   : > { %v680_v27 = vpop.f32.mrf.mxu1 }
 0x275   : > { %2211 = vmatmul.mubr.f32.gmra.mxu0 %v809_v3 }
 0x276   : > { %v683_v30 = vpop.f32.mrf.mxu1 }
 0x277   : > { %v810_v26 = vmax.f32 %v683_v30, 0.0 }
 0x278   : > { %v685_v23 = vpop.f32.mrf.mxu1 }
 0x279   : > { %2213 = vmatprep.mubr.f32.mxu0 %v810_v26 }
 0x27a   : > { %v688_v6 = vpop.f32.mrf.mxu1 }
 0x27b   : > { %v811_v7 = vmax.f32 %v688_v6, 0.0 }
 0x27c   : > { %v690_v19 = vpop.f32.mrf.mxu1 }
 0x27d   : > { %2214 = vmatmul.mubr.f32.gmra.mxu0 %v811_v7 }
 0x27e   : > { %v693_v22 = vpop.f32.mrf.mxu1 }
 0x27f   : > { %v812_v48 = vmax.f32 %v693_v22, 0.0 }
 0x280   : > { %v695_v35 = vpop.f32.mrf.mxu1 }
 0x281   : > { %2216 = vmatprep.mubr.f32.mxu0 %v812_v48 }
 0x282   : > { %v698_v39 = vpop.f32.mrf.mxu1 }
 0x283   : > { %v813_v38 = vmax.f32 %v698_v39, 0.0 }
 0x284   : > { %v700_v31 = vpop.f32.mrf.mxu1 }
 0x285   : > { %2217 = vmatmul.mubr.f32.gmra.mxu0 %v813_v38 }
 0x286   : > { %v703_v34 = vpop.f32.mrf.mxu1 }
 0x287   : > { %v814_v42 = vmax.f32 %v703_v34, 0.0 }
 0x288   : > { %v705_v27 = vpop.f32.mrf.mxu1 }
 0x289   : > { %2219 = vmatprep.mubr.f32.mxu0 %v814_v42 }
 0x28a   : > { %v708_v3 = vpop.f32.mrf.mxu1 }
 0x28b   : > { %v815_v30 = vmax.f32 %v708_v3, 0.0 }
 0x28c   : > { %v710_v23 = vpop.f32.mrf.mxu1 }
 0x28d   : > { %2220 = vmatmul.mubr.f32.gmra.mxu0 %v815_v30 }
 0x28e   : > { %v713_v26 = vpop.f32.mrf.mxu1 }
 0x28f   : > { %v816_v6 = vmax.f32 %v713_v26, 0.0 }
 0x290   : > { %v715_v19 = vpop.f32.mrf.mxu1 }
 0x291   : > { %2222 = vmatprep.mubr.f32.mxu0 %v816_v6 }
 0x292   : > { %v718_v7 = vpop.f32.mrf.mxu1 }
 0x293   : > { %v817_v22 = vmax.f32 %v718_v7, 0.0 }
 0x294   : > { %v720_v35 = vpop.f32.mrf.mxu1 }
 0x295   : > { %2223 = vmatmul.mubr.f32.gmra.mxu0 %v817_v22 }
 0x296   : > { %v723_v48 = vpop.f32.mrf.mxu1 }
 0x297   : > { %v818_v39 = vmax.f32 %v723_v48, 0.0 }
 0x298   : > { %v725_v31 = vpop.f32.mrf.mxu1 }
 0x299   : > { %2225 = vmatprep.mubr.f32.mxu0 %v818_v39 }
 0x29a   : > { %v728_v38 = vpop.f32.mrf.mxu1 }
 0x29b   : > { %v819_v34 = vmax.f32 %v728_v38, 0.0 }
 0x29c   : > { %v730_v27 = vpop.f32.mrf.mxu1 }
 0x29d   : > { %2226 = vmatmul.mubr.f32.gmra.mxu0 %v819_v34 }
 0x29e   : > { %v733_v42 = vpop.f32.mrf.mxu1 }
 0x29f   : > { %v820_v3 = vmax.f32 %v733_v42, 0.0 }
 0x2a0   : > { %v735_v23 = vpop.f32.mrf.mxu1 }
 0x2a1   : > { %2228 = vmatprep.mubr.f32.mxu0 %v820_v3 }
 0x2a2   : > { %v738_v30 = vpop.f32.mrf.mxu1 }
 0x2a3   : > { %v821_v26 = vmax.f32 %v738_v30, 0.0 }
 0x2a4   : > { %v740_v19 = vpop.f32.mrf.mxu1 }
 0x2a5   : > { %2229 = vmatmul.mubr.f32.gmra.mxu0 %v821_v26 }
 0x2a6   : > { %v743_v6 = vpop.f32.mrf.mxu1 }
 0x2a7   : > { %v822_v7 = vmax.f32 %v743_v6, 0.0 }
 0x2a8   : > { %v745_v35 = vpop.f32.mrf.mxu1 }
 0x2a9   : > { %2231 = vmatprep.mubr.f32.mxu0 %v822_v7 }
 0x2aa   : > { %v748_v22 = vpop.f32.mrf.mxu1 }
 0x2ab   : > { %v823_v48 = vmax.f32 %v748_v22, 0.0 }
 0x2ac   : > { %v750_v31 = vpop.f32.mrf.mxu1 }
 0x2ad   : > { %2232 = vmatmul.mubr.f32.gmra.mxu0 %v823_v48 }
 0x2ae   : > { %v753_v39 = vpop.f32.mrf.mxu1 }
 0x2af   : > { %v824_v38 = vmax.f32 %v753_v39, 0.0 }
 0x2b0   : > { %v755_v27 = vpop.f32.mrf.mxu1 }
 0x2b1   : > { %2234 = vmatprep.mubr.f32.mxu0 %v824_v38 }
 0x2b2   : > { %v758_v34 = vpop.f32.mrf.mxu1 }
 0x2b3   : > { %v825_v42 = vmax.f32 %v758_v34, 0.0 }
 0x2b4   : > { %v760_v23 = vpop.f32.mrf.mxu1 }
 0x2b5   : > { %2235 = vmatmul.mubr.f32.gmra.mxu0 %v825_v42 }
 0x2b6   : > { %v763_v3 = vpop.f32.mrf.mxu1 }
 0x2b7   : > { %v826_v30 = vmax.f32 %v763_v3, 0.0 }
 0x2b8   : > { %v765_v19 = vpop.f32.mrf.mxu1 }
 0x2b9   : > { %2237 = vmatprep.mubr.f32.mxu0 %v826_v30 }
 0x2ba   : > { %v768_v26 = vpop.f32.mrf.mxu1 }
 0x2bb   : > { %v827_v6 = vmax.f32 %v768_v26, 0.0 }
 0x2bc   : > { %v770_v35 = vpop.f32.mrf.mxu1 }
 0x2bd   : > { %2238 = vmatmul.mubr.f32.gmra.mxu0 %v827_v6 }
 0x2be   : > { %v773_v7 = vpop.f32.mrf.mxu1 }
 0x2bf   : > { %v828_v22 = vmax.f32 %v773_v7, 0.0 }
 0x2c0   : > { %v775_v31 = vpop.f32.mrf.mxu1 }
 0x2c1   : > { %2240 = vmatprep.mubr.f32.mxu0 %v828_v22 }
 0x2c2   : > { %v778_v48 = vpop.f32.mrf.mxu1 }
 0x2c3   : > { %v829_v39 = vmax.f32 %v778_v48, 0.0 }
 0x2c4   : > { %v780_v27 = vpop.f32.mrf.mxu1 }
 0x2c5   : > { %2241 = vmatmul.mubr.f32.gmra.mxu0 %v829_v39 }
 0x2c6   : > { %v783_v38 = vpop.f32.mrf.mxu1 }
 0x2c7   : > { %v830_v34 = vmax.f32 %v783_v38, 0.0 }
 0x2c8   : > { %v785_v23 = vpop.f32.mrf.mxu1 }
 0x2c9   : > { %2243 = vmatprep.mubr.f32.mxu0 %v830_v34 }
 0x2ca   : > { %v788_v42 = vpop.f32.mrf.mxu1 }
 0x2cb   : > { %v831_v3 = vmax.f32 %v788_v42, 0.0 }
 0x2cc   : > { %v790_v19 = vpop.f32.mrf.mxu1 }
 0x2cd   : > { %2244 = vmatmul.mubr.f32.gmra.mxu0 %v831_v3 }
 0x2ce   : > { %v793_v30 = vpop.f32.mrf.mxu1 }
 0x2cf   : > { %v832_v26 = vmax.f32 %v793_v30, 0.0 }
 0x2d0   : > { %v795_v35 = vpop.f32.mrf.mxu1 }
 0x2d1   : > { %2246 = vmatprep.mubr.f32.mxu0 %v832_v26 }
 0x2d2   : > { %v798_v6 = vpop.f32.mrf.mxu1 }
 0x2d3   : > { %v833_v7 = vmax.f32 %v798_v6, 0.0 }
 0x2d4   : > { %v800_v31 = vpop.f32.mrf.mxu1 }
 0x2d5   : > { %2247 = vmatmul.mubr.f32.gmra.mxu0 %v833_v7  ;;  %v3320_v7 = vmov 0.0  }
 0x2d6   : > { %1139 = vmatprep.mubr.f32.mxu0 %v2829_v49 }
 0x31d   : > { %v2203_v22 = vpop.f32.mrf.mxu0 }
 0x31f   : > { %v916_v48 = vpop.f32.mrf.mxu0 }
 0x325   : > { %v2206_v39 = vpop.f32.mrf.mxu0 }
 0x327   : > { %v926_v27 = vpop.f32.mrf.mxu0 }
 0x32d   : > { %v2209_v38 = vpop.f32.mrf.mxu0 }
 0x32f   : > { %v936_v34 = vpop.f32.mrf.mxu0 }
 0x335   : > { %v2212_v23 = vpop.f32.mrf.mxu0 }
 0x337   : > { %v946_v42 = vpop.f32.mrf.mxu0 }
 0x33d   : > { %v2215_v19 = vpop.f32.mrf.mxu0 }
 0x33f   : > { %v956_v3 = vpop.f32.mrf.mxu0 }
 0x345   : > { %v2218_v18 = vpop.f32.mrf.mxu0 }
 0x347   : > { %v966_v30 = vpop.f32.mrf.mxu0 }
 0x34d   : > { %v2221_v35 = vpop.f32.mrf.mxu0 }
 0x34f   : > { %v976_v26 = vpop.f32.mrf.mxu0 }
 0x355   : > { %v2224_v17 = vpop.f32.mrf.mxu0 }
 0x356   : > { %1076 = vmatpush1.msra.mxu0 %v2224_v17 }
 0x357   : > { %v986_v6 = vpop.f32.mrf.mxu0  ;;  %1077 = vmatprep.subr.mxu0 %v3320_v7 }
 0x358   : > { %1078 = vmatpush1.msra.mxu0 %v986_v6 }
 0x359   : > { %1079 = vmatprep.subr.mxu0 %v3320_v7 }
 0x35a   : > { %1080 = vmatpush1.msra.mxu0 %v2221_v35 }
 0x35b   : > { %1081 = vmatprep.subr.mxu0 %v3320_v7 }
 0x35c   : > { %1082 = vmatpush1.msra.mxu0 %v976_v26 }
 0x35d   : > { %1083 = vmatprep.subr.mxu0 %v3320_v7  ;;  %v2227_v49 = vpop.f32.mrf.mxu0 }
 0x35e   : > { %1084 = vmatpush1.msra.mxu0 %v2218_v18 }
 0x35f   : > { %1085 = vmatprep.subr.mxu0 %v3320_v7  ;;  %v996_v17 = vpop.f32.mrf.mxu0 }
 0x360   : > { %1086 = vmatpush1.msra.mxu0 %v966_v30 }
 0x361   : > { %1087 = vmatprep.subr.mxu0 %v3320_v7 }
 0x362   : > { %1088 = vmatpush1.msra.mxu0 %v2215_v19 }
 0x363   : > { %1089 = vmatprep.subr.mxu0 %v3320_v7 }
 0x364   : > { %1090 = vmatpush1.msra.mxu0 %v956_v3 }
 0x365   : > { %1091 = vmatprep.subr.mxu0 %v3320_v7  ;;  %v2230_v18 = vpop.f32.mrf.mxu0 }
 0x366   : > { %1092 = vmatpush1.msra.mxu0 %v2212_v23 }
 0x367   : > { %1093 = vmatprep.subr.mxu0 %v3320_v7  ;;  %v1006_v31 = vpop.f32.mrf.mxu0 }
 0x368   : > { %1094 = vmatpush1.msra.mxu0 %v946_v42 }
 0x369   : > { %1095 = vmatprep.subr.mxu0 %v3320_v7 }
 0x36a   : > { %1096 = vmatpush1.msra.mxu0 %v2209_v38 }
 0x36b   : > { %1097 = vmatprep.subr.mxu0 %v3320_v7 }
 0x36c   : > { %1098 = vmatpush1.msra.mxu0 %v936_v34 }
 0x36d   : > { %1099 = vmatprep.subr.mxu0 %v3320_v7  ;;  %v2233_v38 = vpop.f32.mrf.mxu0 }
 0x36e   : > { %1100 = vmatpush1.msra.mxu0 %v2206_v39 }
 0x36f   : > { %1101 = vmatprep.subr.mxu0 %v3320_v7  ;;  %v1016_v23 = vpop.f32.mrf.mxu0 }
 0x370   : > { %1102 = vmatpush1.msra.mxu0 %v926_v27 }
 0x371   : > { %1103 = vmatprep.subr.mxu0 %v3320_v7 }
 0x372   : > { %1104 = vmatpush1.msra.mxu0 %v2203_v22 }
 0x373   : > { %1105 = vmatprep.subr.mxu0 %v3320_v7 }
 0x374   : > { %1106 = vmatpush1.msra.mxu0 %v916_v48 }
 0x375   : > { %1107 = vmatprep.subr.mxu0 %v3320_v7  ;;  %v2236_v34 = vpop.f32.mrf.mxu0 }
 0x377   : > { %v1026_v42 = vpop.f32.mrf.mxu0 }
 0x37d   : > { %v2239_v19 = vpop.f32.mrf.mxu0 }
 0x37f   : > { %v1036_v39 = vpop.f32.mrf.mxu0 }
 0x385   : > { %v2242_v3 = vpop.f32.mrf.mxu0 }
 0x387   : > { %v1046_v30 = vpop.f32.mrf.mxu0 }
 0x38d   : > { %v2245_v35 = vpop.f32.mrf.mxu0 }
 0x38f   : > { %v1056_v27 = vpop.f32.mrf.mxu0 }
 0x395   : > { %v2248_v26 = vpop.f32.mrf.mxu0 }
 0x396   : > { %1108 = vmatpush2.msra.mxu0 %v2248_v26 }
 0x397   : > { %v1066_v6 = vpop.f32.mrf.mxu0  ;;  %1109 = vmatprep.subr.mxu0 %v3320_v7 }
 0x398   : > { %1110 = vmatpush2.msra.mxu0 %v1066_v6 }
 0x399   : > { %1111 = vmatprep.subr.mxu0 %v3320_v7 }
 0x39a   : > { %1112 = vmatpush2.msra.mxu0 %v2245_v35 }
 0x39b   : > { %1113 = vmatprep.subr.mxu0 %v3320_v7 }
 0x39c   : > { %1114 = vmatpush2.msra.mxu0 %v1056_v27 }
 0x39d   : > { %1115 = vmatprep.subr.mxu0 %v3320_v7 }
 0x39e   : > { %1116 = vmatpush2.msra.mxu0 %v2242_v3 }
 0x39f   : > { %1117 = vmatprep.subr.mxu0 %v3320_v7 }
 0x3a0   : > { %1118 = vmatpush2.msra.mxu0 %v1046_v30 }
 0x3a1   : > { %1119 = vmatprep.subr.mxu0 %v3320_v7 }
 0x3a2   : > { %1120 = vmatpush2.msra.mxu0 %v2239_v19 }
 0x3a3   : > { %1121 = vmatprep.subr.mxu0 %v3320_v7 }
 0x3a4   : > { %1122 = vmatpush2.msra.mxu0 %v1036_v39 }
 0x3a5   : > { %1123 = vmatprep.subr.mxu0 %v3320_v7 }
 0x3a6   : > { %1124 = vmatpush2.msra.mxu0 %v2236_v34 }
 0x3a7   : > { %1125 = vmatprep.subr.mxu0 %v3320_v7 }
 0x3a8   : > { %1126 = vmatpush2.msra.mxu0 %v1026_v42 }
 0x3a9   : > { %1127 = vmatprep.subr.mxu0 %v3320_v7 }
 0x3aa   : > { %1128 = vmatpush2.msra.mxu0 %v2233_v38 }
 0x3ab   : > { %1129 = vmatprep.subr.mxu0 %v3320_v7 }
 0x3ac   : > { %1130 = vmatpush2.msra.mxu0 %v1016_v23 }
 0x3ad   : > { %1131 = vmatprep.subr.mxu0 %v3320_v7 }
 0x3ae   : > { %1132 = vmatpush2.msra.mxu0 %v2230_v18 }
 0x3af   : > { %1133 = vmatprep.subr.mxu0 %v3320_v7 }
 0x3b0   : > { %1134 = vmatpush2.msra.mxu0 %v1006_v31 }
 0x3b1   : > { %1135 = vmatprep.subr.mxu0 %v3320_v7 }
 0x3b2   : > { %1136 = vmatpush2.msra.mxu0 %v2227_v49 }
 0x3b3   : > { %1137 = vmatprep.subr.mxu0 %v3320_v7 }
 0x3b4   : > { %1138 = vmatpush2.msra.mxu0 %v996_v17 }
 0x3b5   : > { %1140 = vmatmul.mubr.f32.vlgmr.msra.gmra.mxu0 %v2867_v20  ;;  %v3321_v20 = vld [vmem:[#allocation16_spill] sm:$0xff] }
 0x3b6   : > { %1144 = vmatprep.mubr.f32.mxu0 %v2870_v21  ;;  %v3322_v21 = vld [vmem:[#allocation17_spill] sm:$0xff] }
 0x3b9   : > { %1145 = vmatmul.mubr.f32.gmra.mxu0 %v2875_v24  ;;  %v3323_v24 = vld [vmem:[#allocation18_spill] sm:$0xff] }
 0x3ba   : > { %1149 = vmatprep.mubr.f32.mxu0 %v2877_v25  ;;  %v3324_v25 = vld [vmem:[#allocation19_spill] sm:$0xff] }
 0x3bd   : > { %1150 = vmatmul.mubr.f32.gmra.mxu0 %v2881_v28  ;;  %v3325_v28 = vld [vmem:[#allocation20_spill] sm:$0xff] }
 0x3be   : > { %1154 = vmatprep.mubr.f32.mxu0 %v2883_v29  ;;  %v3326_v29 = vld [vmem:[#allocation21_spill] sm:$0xff] }
 0x3c1   : > { %1155 = vmatmul.mubr.f32.gmra.mxu0 %v2887_v32  ;;  %v3327_v32 = vld [vmem:[#allocation22_spill] sm:$0xff] }
 0x3c2   : > { %1159 = vmatprep.mubr.f32.mxu0 %v2889_v33  ;;  %v3328_v33 = vld [vmem:[#allocation23_spill] sm:$0xff] }
 0x3c5   : > { %1160 = vmatmul.mubr.f32.gmra.mxu0 %v2893_v36  ;;  %v3329_v36 = vld [vmem:[#allocation24_spill] sm:$0xff] }
 0x3c6   : > { %1164 = vmatprep.mubr.f32.mxu0 %v2895_v37  ;;  %v3330_v37 = vld [vmem:[#allocation25_spill] sm:$0xff] }
 0x3c9   : > { %1165 = vmatmul.mubr.f32.gmra.mxu0 %v2899_v40  ;;  %v3331_v40 = vld [vmem:[#allocation26_spill] sm:$0xff] }
 0x3ca   : > { %1169 = vmatprep.mubr.f32.mxu0 %v2901_v41  ;;  %v3332_v41 = vld [vmem:[#allocation27_spill] sm:$0xff] }
 0x3cd   : > { %1170 = vmatmul.mubr.f32.gmra.mxu0 %v2905_v43  ;;  %v3333_v43 = vld [vmem:[#allocation28_spill] sm:$0xff] }
 0x3ce   : > { %1174 = vmatprep.mubr.f32.mxu0 %v2907_v44  ;;  %v3334_v44 = vld [vmem:[#allocation29_spill] sm:$0xff] }
 0x3d1   : > { %1175 = vmatmul.mubr.f32.gmra.mxu0 %v2911_v45  ;;  %v3335_v45 = vld [vmem:[#allocation30_spill] sm:$0xff] }
 0x3d2   : > { %1179 = vmatprep.mubr.f32.mxu0 %v2913_v46  ;;  %v3336_v46 = vld [vmem:[#allocation31_spill] sm:$0xff] }
 0x3d5   : > { %1180 = vmatmul.mubr.f32.gmra.mxu0 %v2917_v47  ;;  %v3337_v47 = vld [vmem:[#allocation32_spill] sm:$0xff] }
 0x3d6   : > { %1184 = vmatprep.mubr.f32.mxu0 %v2919_v50  ;;  %v3338_v50 = vld [vmem:[#allocation33_spill] sm:$0xff] }
 0x3d9   : > { %1185 = vmatmul.mubr.f32.gmra.mxu0 %v2923_v51 }
 0x3da   : > { %1189 = vmatprep.mubr.f32.mxu0 %v2925_v52 }
 0x3dd   : > { %1190 = vmatmul.mubr.f32.gmra.mxu0 %v2929_v53 }
 0x3de   : > { %1194 = vmatprep.mubr.f32.mxu0 %v2931_v54 }
 0x3e1   : > { %1195 = vmatmul.mubr.f32.gmra.mxu0 %v2935_v55 }
 0x3e2   : > { %1199 = vmatprep.mubr.f32.mxu0 %v2937_v56 }
 0x3e5   : > { %1200 = vmatmul.mubr.f32.gmra.mxu0 %v2941_v57 }
 0x3e6   : > { %1204 = vmatprep.mubr.f32.mxu0 %v2943_v58 }
 0x3e9   : > { %1205 = vmatmul.mubr.f32.gmra.mxu0 %v2947_v59 }
 0x3ea   : > { %1209 = vmatprep.mubr.f32.mxu0 %v2949_v60 }
 0x3ed   : > { %1210 = vmatmul.mubr.f32.gmra.mxu0 %v2953_v61 }
 0x3ee   : > { %1214 = vmatprep.mubr.f32.mxu0 %v2955_v62 }
 0x3f1   : > { %1215 = vmatmul.mubr.f32.gmra.mxu0 %v2959_v63 }
 0x3f2   : > { %1219 = vmatprep.mubr.f32.mxu0 %v2961_v0 }
 0x3f5   : > { %1220 = vmatmul.mubr.f32.gmra.mxu0 %v2965_v1 }
 0x3f6   : > { %1224 = vmatprep.mubr.f32.mxu0 %v2967_v2 }
 0x3f9   : > { %1225 = vmatmul.mubr.f32.gmra.mxu0 %v2971_v4 }
 0x3fa   : > { %1229 = vmatprep.mubr.f32.mxu0 %v2973_v5 }
 0x3fd   : > { %1230 = vmatmul.mubr.f32.gmra.mxu0 %v2977_v8 }
 0x3fe   : > { %1234 = vmatprep.mubr.f32.mxu0 %v2979_v9 }
 0x401   : > { %1235 = vmatmul.mubr.f32.gmra.mxu0 %v2984_v10 }
 0x402   : > { %1239 = vmatprep.mubr.f32.mxu0 %v2986_v11 }
 0x405   : > { %1240 = vmatmul.mubr.f32.gmra.mxu0 %v2990_v12 }
 0x406   : > { %1244 = vmatprep.mubr.f32.mxu0 %v2992_v13 }
 0x409   : > { %1245 = vmatmul.mubr.f32.gmra.mxu0 %v2996_v14 }
 0x40a   : > { %1249 = vmatprep.mubr.f32.mxu0 %v2998_v15 }
 0x40d   : > { %1250 = vmatmul.mubr.f32.gmra.mxu0 %v3002_v16 }
 0x40e   : > { %1254 = vmatprep.mubr.f32.mxu0 %v3321_v20 }
 0x411   : > { %1255 = vmatmul.mubr.f32.gmra.mxu0 %v3322_v21 }
 0x412   : > { %1259 = vmatprep.mubr.f32.mxu0 %v3323_v24 }
 0x415   : > { %1260 = vmatmul.mubr.f32.gmra.mxu0 %v3324_v25 }
 0x416   : > { %1264 = vmatprep.mubr.f32.mxu0 %v3325_v28 }
 0x419   : > { %1265 = vmatmul.mubr.f32.gmra.mxu0 %v3326_v29 }
 0x41a   : > { %1269 = vmatprep.mubr.f32.mxu0 %v3327_v32 }
 0x41d   : > { %1270 = vmatmul.mubr.f32.gmra.mxu0 %v3328_v33 }
 0x41e   : > { %1274 = vmatprep.mubr.f32.mxu0 %v3329_v36 }
 0x421   : > { %1275 = vmatmul.mubr.f32.gmra.mxu0 %v3330_v37 }
 0x422   : > { %1279 = vmatprep.mubr.f32.mxu0 %v3331_v40 }
 0x425   : > { %1280 = vmatmul.mubr.f32.gmra.mxu0 %v3332_v41 }
 0x426   : > { %1284 = vmatprep.mubr.f32.mxu0 %v3333_v43 }
 0x429   : > { %1285 = vmatmul.mubr.f32.gmra.mxu0 %v3334_v44 }
 0x42a   : > { %1289 = vmatprep.mubr.f32.mxu0 %v3335_v45 }
 0x42d   : > { %1290 = vmatmul.mubr.f32.gmra.mxu0 %v3336_v46 }
 0x42e   : > { %1294 = vmatprep.mubr.f32.mxu0 %v3337_v47 }
 0x431   : > { %1295 = vmatmul.mubr.f32.gmra.mxu0 %v3338_v50 }
 0x475   : > { %v1141_v51 = vpop.f32.mrf.mxu0 }
 0x476   : > { %1300 = vst [vmem:[#allocation2] sm:$0xff] %v1141_v51 }
 0x477   : > { %v1143_v52 = vpop.f32.mrf.mxu0 }
 0x479   : > { %v1146_v53 = vpop.f32.mrf.mxu0 }
 0x47a   : > { %1301 = vst [vmem:[#allocation2 + $0x8] sm:$0xff] %v1146_v53 }
 0x47b   : > { %v1148_v54 = vpop.f32.mrf.mxu0 }
 0x47d   : > { %v1151_v55 = vpop.f32.mrf.mxu0 }
 0x47e   : > { %1302 = vst [vmem:[#allocation2 + $0x10] sm:$0xff] %v1151_v55 }
 0x47f   : > { %v1153_v56 = vpop.f32.mrf.mxu0 }
 0x481   : > { %v1156_v57 = vpop.f32.mrf.mxu0 }
 0x482   : > { %1303 = vst [vmem:[#allocation2 + $0x18] sm:$0xff] %v1156_v57 }
 0x483   : > { %v1158_v58 = vpop.f32.mrf.mxu0 }
 0x485   : > { %v1161_v59 = vpop.f32.mrf.mxu0 }
 0x486   : > { %1304 = vst [vmem:[#allocation2 + $0x20] sm:$0xff] %v1161_v59 }
 0x487   : > { %v1163_v60 = vpop.f32.mrf.mxu0 }
 0x489   : > { %v1166_v61 = vpop.f32.mrf.mxu0 }
 0x48a   : > { %1305 = vst [vmem:[#allocation2 + $0x28] sm:$0xff] %v1166_v61 }
 0x48b   : > { %v1168_v62 = vpop.f32.mrf.mxu0 }
 0x48d   : > { %v1171_v63 = vpop.f32.mrf.mxu0 }
 0x48e   : > { %1306 = vst [vmem:[#allocation2 + $0x30] sm:$0xff] %v1171_v63 }
 0x48f   : > { %v1173_v0 = vpop.f32.mrf.mxu0 }
 0x491   : > { %v1176_v1 = vpop.f32.mrf.mxu0 }
 0x492   : > { %1307 = vst [vmem:[#allocation2 + $0x38] sm:$0xff] %v1176_v1 }
 0x493   : > { %v1178_v2 = vpop.f32.mrf.mxu0 }
 0x495   : > { %v1181_v4 = vpop.f32.mrf.mxu0 }
 0x496   : > { %1308 = vst [vmem:[#allocation2 + $0x40] sm:$0xff] %v1181_v4 }
 0x497   : > { %v1183_v5 = vpop.f32.mrf.mxu0 }
 0x499   : > { %v1186_v8 = vpop.f32.mrf.mxu0 }
 0x49a   : > { %1309 = vst [vmem:[#allocation2 + $0x48] sm:$0xff] %v1186_v8 }
 0x49b   : > { %v1188_v9 = vpop.f32.mrf.mxu0 }
 0x49d   : > { %v1191_v10 = vpop.f32.mrf.mxu0 }
 0x49e   : > { %1310 = vst [vmem:[#allocation2 + $0x50] sm:$0xff] %v1191_v10 }
 0x49f   : > { %v1193_v11 = vpop.f32.mrf.mxu0 }
 0x4a1   : > { %v1196_v12 = vpop.f32.mrf.mxu0 }
 0x4a2   : > { %1311 = vst [vmem:[#allocation2 + $0x58] sm:$0xff] %v1196_v12 }
 0x4a3   : > { %v1198_v13 = vpop.f32.mrf.mxu0 }
 0x4a5   : > { %v1201_v14 = vpop.f32.mrf.mxu0 }
 0x4a6   : > { %1312 = vst [vmem:[#allocation2 + $0x60] sm:$0xff] %v1201_v14 }
 0x4a7   : > { %v1203_v15 = vpop.f32.mrf.mxu0 }
 0x4a9   : > { %v1206_v16 = vpop.f32.mrf.mxu0 }
 0x4aa   : > { %1313 = vst [vmem:[#allocation2 + $0x68] sm:$0xff] %v1206_v16 }
 0x4ab   : > { %v1208_v22 = vpop.f32.mrf.mxu0 }
 0x4ad   : > { %v1211_v48 = vpop.f32.mrf.mxu0 }
 0x4ae   : > { %1314 = vst [vmem:[#allocation2 + $0x70] sm:$0xff] %v1211_v48 }
 0x4af   : > { %v1213_v7 = vpop.f32.mrf.mxu0 }
 0x4b1   : > { %v1216_v49 = vpop.f32.mrf.mxu0 }
 0x4b2   : > { %1315 = vst [vmem:[#allocation2 + $0x78] sm:$0xff] %v1216_v49 }
 0x4b3   : > { %v1218_v17 = vpop.f32.mrf.mxu0 }
 0x4b5   : > { %v1221_v18 = vpop.f32.mrf.mxu0 }
 0x4b6   : > { %1316 = vst [vmem:[#allocation2 + $0x80] sm:$0xff] %v1221_v18 }
 0x4b7   : > { %v1223_v31 = vpop.f32.mrf.mxu0 }
 0x4b9   : > { %v1226_v38 = vpop.f32.mrf.mxu0 }
 0x4ba   : > { %1317 = vst [vmem:[#allocation2 + $0x88] sm:$0xff] %v1226_v38 }
 0x4bb   : > { %v1228_v23 = vpop.f32.mrf.mxu0 }
 0x4bd   : > { %v1231_v34 = vpop.f32.mrf.mxu0 }
 0x4be   : > { %1318 = vst [vmem:[#allocation2 + $0x90] sm:$0xff] %v1231_v34 }
 0x4bf   : > { %v1233_v42 = vpop.f32.mrf.mxu0 }
 0x4c1   : > { %v1236_v19 = vpop.f32.mrf.mxu0 }
 0x4c2   : > { %1319 = vst [vmem:[#allocation2 + $0x98] sm:$0xff] %v1236_v19 }
 0x4c3   : > { %v1238_v39 = vpop.f32.mrf.mxu0 }
 0x4c5   : > { %v1241_v3 = vpop.f32.mrf.mxu0 }
 0x4c6   : > { %1320 = vst [vmem:[#allocation2 + $0xa0] sm:$0xff] %v1241_v3 }
 0x4c7   : > { %v1243_v30 = vpop.f32.mrf.mxu0 }
 0x4c9   : > { %v1246_v35 = vpop.f32.mrf.mxu0 }
 0x4ca   : > { %1321 = vst [vmem:[#allocation2 + $0xa8] sm:$0xff] %v1246_v35 }
 0x4cb   : > { %v1248_v27 = vpop.f32.mrf.mxu0 }
 0x4cd   : > { %v1251_v26 = vpop.f32.mrf.mxu0 }
 0x4ce   : > { %1322 = vst [vmem:[#allocation2 + $0xb0] sm:$0xff] %v1251_v26 }
 0x4cf   : > { %v1253_v6 = vpop.f32.mrf.mxu0 }
 0x4d1   : > { %v1256_v20 = vpop.f32.mrf.mxu0 }
 0x4d2   : > { %1323 = vst [vmem:[#allocation2 + $0xb8] sm:$0xff] %v1256_v20 }
 0x4d3   : > { %v1258_v21 = vpop.f32.mrf.mxu0 }
 0x4d5   : > { %v1261_v24 = vpop.f32.mrf.mxu0 }
 0x4d6   : > { %1324 = vst [vmem:[#allocation2 + $0xc0] sm:$0xff] %v1261_v24 }
 0x4d7   : > { %v1263_v25 = vpop.f32.mrf.mxu0 }
 0x4d9   : > { %v1266_v28 = vpop.f32.mrf.mxu0 }
 0x4da   : > { %1325 = vst [vmem:[#allocation2 + $0xc8] sm:$0xff] %v1266_v28 }
 0x4db   : > { %v1268_v29 = vpop.f32.mrf.mxu0 }
 0x4dd   : > { %v1271_v32 = vpop.f32.mrf.mxu0 }
 0x4de   : > { %1326 = vst [vmem:[#allocation2 + $0xd0] sm:$0xff] %v1271_v32 }
 0x4df   : > { %v1273_v33 = vpop.f32.mrf.mxu0 }
 0x4e1   : > { %v1276_v36 = vpop.f32.mrf.mxu0 }
 0x4e2   : > { %1327 = vst [vmem:[#allocation2 + $0xd8] sm:$0xff] %v1276_v36 }
 0x4e3   : > { %v1278_v37 = vpop.f32.mrf.mxu0 }
 0x4e5   : > { %v1281_v40 = vpop.f32.mrf.mxu0 }
 0x4e6   : > { %1328 = vst [vmem:[#allocation2 + $0xe0] sm:$0xff] %v1281_v40 }
 0x4e7   : > { %v1283_v41 = vpop.f32.mrf.mxu0 }
 0x4e9   : > { %v1286_v43 = vpop.f32.mrf.mxu0 }
 0x4ea   : > { %1329 = vst [vmem:[#allocation2 + $0xe8] sm:$0xff] %v1286_v43 }
 0x4eb   : > { %v1288_v44 = vpop.f32.mrf.mxu0 }
 0x4ed   : > { %v1291_v45 = vpop.f32.mrf.mxu0 }
 0x4ee   : > { %1330 = vst [vmem:[#allocation2 + $0xf0] sm:$0xff] %v1291_v45 }
 0x4ef   : > { %v1293_v46 = vpop.f32.mrf.mxu0 }
 0x4f1   : > { %v1296_v47 = vpop.f32.mrf.mxu0 }
 0x4f2   : > { %1331 = vst [vmem:[#allocation2 + $0xf8] sm:$0xff] %v1296_v47 }
 0x4f3   : > { %v1298_v50 = vpop.f32.mrf.mxu0 }
 0x4f4 PF: > { %v1365_v52 = vld [vmem:[#allocation2 + $0x78] sm:$0xff]  ;;  %v1364_v54 = vld [vmem:[#allocation2 + $0x70] sm:$0xff]  ;;  %v1379_v55 = vld [vmem:[#allocation2 + $0xe8] sm:$0xff]  ;;  %s1888_s11 = sshll.u32 %s2732_s19, 7  ;;  %s1928_s20 = sshll.u32 %s2732_s19, 12 }
 0x4f5   : > { %v1380_v53 = vld [vmem:[#allocation2 + $0xf0] sm:$0xff]  ;;  %v1363_v56 = vld [vmem:[#allocation2 + $0x68] sm:$0xff]  ;;  %v1378_v57 = vld [vmem:[#allocation2 + $0xe0] sm:$0xff]  ;;  %s3155_s14 = scalar_lea.vmem [#allocation2], %s1888_s11  ;;  %s1782_s22 = sshll.u32 %s2824_s10, 4  ;;  %s3217_s22 = int_to_ptr.vmem [resolvable:$true] %s1782_s22 }
 0x4f6   : > { %v1362_v59 = vld [vmem:[#allocation2 + $0x60] sm:$0xff]  ;;  %v1377_v61 = vld [vmem:[#allocation2 + $0xd8] sm:$0xff]  ;;  %v1376_v63 = vld [vmem:[#allocation2 + $0xd0] sm:$0xff]  ;;  %s3215_s29 = scalar_lea.hbm %s3268_s4, %s1928_s20  ;;  %s3224_s19 = scalar_lea.sflag [#allocation5], %s232_s27 }
 0x4f7   : > { %v1361_v62 = vld [vmem:[#allocation2 + $0x58] sm:$0xff]  ;;  %v1360_v0 = vld [vmem:[#allocation2 + $0x50] sm:$0xff]  ;;  %v1375_v1 = vld [vmem:[#allocation2 + $0xc8] sm:$0xff]  ;;  %s2600_s5 = scalar_lea.vmem %s3217_s22, 4096  ;;  %p3339_p2 = scmp.ne.s32.totalorder %s3291_s25, 0 }
 0x4f8   : > { %v1359_v2 = vld [vmem:[#allocation2 + $0x48] sm:$0xff]  ;;  %v1374_v4 = vld [vmem:[#allocation2 + $0xc0] sm:$0xff]  ;;  %v1373_v8 = vld [vmem:[#allocation2 + $0xb8] sm:$0xff]  ;;  %p2601_p10 = scmp.ne.s32.totalorder %s3217_s22, %s2600_s5  ;;  %s2683_s6 = smov [#allocation11]  }
 0x4f9   : > { %v1381_v51 = vld [vmem:[#allocation2 + $0xf8] sm:$0xff]  ;;  %v3158_v58 = vld [vmem:[%s3155_s14] sm:$0xff]  ;;  %v1372_v10 = vld [vmem:[#allocation2 + $0xb0] sm:$0xff]  ;;  %s2604_s7 = sshll.u32 %s2683_s6, 4  ;;  %s2605_s7 = int_to_ptr.vmem [resolvable:$false] %s2604_s7 }
 0x4fa   : > { %2025 = vmatprep.subr.mxu0 %v1381_v51  ;;  %2249 = vmatprep.subr.mxu1 %v1381_v51  ;;  %v3161_v60 = vld [vmem:[%s3155_s14 + $0x40] sm:$0xff]  ;;  %v1357_v9 = vld [vmem:[#allocation2 + $0x38] sm:$0xff]  ;;  %v1356_v11 = vld [vmem:[#allocation2 + $0x30] sm:$0xff]  ;;  %p2602_p4 = pnand %p2601_p10, %p3339_p2  ;;  %s2606_s9 = scalar_lea.vmem %s2605_s7, 8192 }
 0x4fb   : > { %2026 = vmatpush3.xpose.msra.mxu0 %v1365_v52  ;;  %2265 = vmatpush3.xpose.msra.mxu1 %v1365_v52  ;;  %v1358_v5 = vld [vmem:[#allocation2 + $0x40] sm:$0xff]  ;;  %v1371_v12 = vld [vmem:[#allocation2 + $0xa8] sm:$0xff]  ;;  %v1369_v16 = vld [vmem:[#allocation2 + $0x98] sm:$0xff]  ;;  %p2607_p7 = scmp.lt.s32.totalorder %s3217_s22, %s2605_s7  ;;  %p2608_p5 = scmp.lt.s32.totalorder %s2606_s9, %s2600_s5 }
 0x4fc   : > { %2027 = vmatprep.subr.mxu0 %v1380_v53  ;;  %2250 = vmatprep.subr.mxu1 %v1380_v53  ;;  %v1355_v13 = vld [vmem:[#allocation2 + $0x28] sm:$0xff]  ;;  %v1370_v14 = vld [vmem:[#allocation2 + $0xa0] sm:$0xff]  ;;  %v1353_v22 = vld [vmem:[#allocation2 + $0x18] sm:$0xff]  ;;  %p2603_p3 = pneg %p2602_p4 }
 0x4fd   : > { %2057 = vmatprep.mubr.f32.mxu0 %v3158_v58  ;;  %2073 = vmatprep.mubr.f32.mxu1 %v3161_v60  ;;  %v1354_v15 = vld [vmem:[#allocation2 + $0x20] sm:$0xff]  ;;  %v1368_v48 = vld [vmem:[#allocation2 + $0x90] sm:$0xff]  ;;  %v1367_v49 = vld [vmem:[#allocation2 + $0x88] sm:$0xff]  ;;  %p2609_p8 = por %p2608_p5, %p2607_p7 }
 0x4fe   : > { %v1352_v7 = vld [vmem:[#allocation2 + $0x10] sm:$0xff]  ;;  %v1351_v17 = vld [vmem:[#allocation2 + $0x8] sm:$0xff]  ;;  %v1366_v18 = vld [vmem:[#allocation2 + $0x80] sm:$0xff] }
 0x4ff   : > { %2028 = vmatpush3.xpose.msra.mxu0 %v1364_v54  ;;  %2266 = vmatpush3.xpose.msra.mxu1 %v1364_v54  ;;  %v1350_v31 = vld [vmem:[#allocation2] sm:$0xff]  ;;  %v1335_v38 = vld [vmem:[%s3155_s14 + $0x8] sm:$0xff]  ;;  %v1336_v34 = vld [vmem:[%s3155_s14 + $0x10] sm:$0xff]  ;;  %p2610_p9 = pnand %p2609_p8, %p2603_p3 }
 0x500   : > { %2029 = vmatprep.subr.mxu0 %v1379_v55  ;;  %2251 = vmatprep.subr.mxu1 %v1379_v55  ;;  %v1343_v23 = vld [vmem:[%s3155_s14 + $0x48] sm:$0xff]  ;;  %v1344_v42 = vld [vmem:[%s3155_s14 + $0x50] sm:$0xff]  ;;  %v1337_v19 = vld [vmem:[%s3155_s14 + $0x18] sm:$0xff] }
 0x501   : > { %v1345_v39 = vld [vmem:[%s3155_s14 + $0x58] sm:$0xff]  ;;  %v1338_v3 = vld [vmem:[%s3155_s14 + $0x20] sm:$0xff]  ;;  %v1339_v35 = vld [vmem:[%s3155_s14 + $0x28] sm:$0xff] }
 0x502   : > { %v1346_v30 = vld [vmem:[%s3155_s14 + $0x60] sm:$0xff]  ;;  %v1347_v27 = vld [vmem:[%s3155_s14 + $0x68] sm:$0xff]  ;;  %v1340_v26 = vld [vmem:[%s3155_s14 + $0x30] sm:$0xff] }
 0x503   : > { %2030 = vmatpush3.xpose.msra.mxu0 %v1363_v56  ;;  %2267 = vmatpush3.xpose.msra.mxu1 %v1363_v56  ;;  %v1348_v6 = vld [vmem:[%s3155_s14 + $0x70] sm:$0xff]  ;;  %v1341_v20 = vld [vmem:[%s3155_s14 + $0x38] sm:$0xff] }
 0x504   : > { %2031 = vmatprep.subr.mxu0 %v1378_v57  ;;  %2252 = vmatprep.subr.mxu1 %v1378_v57  ;;  %v1349_v21 = vld [vmem:[%s3155_s14 + $0x78] sm:$0xff] }
 0x507   : > { %2032 = vmatpush3.xpose.msra.mxu0 %v1362_v59  ;;  %2268 = vmatpush3.xpose.msra.mxu1 %v1362_v59 }
 0x508   : > { %2033 = vmatprep.subr.mxu0 %v1377_v61  ;;  %2253 = vmatprep.subr.mxu1 %v1377_v61 }
 0x50b   : > { %2034 = vmatpush3.xpose.msra.mxu0 %v1361_v62  ;;  %2269 = vmatpush3.xpose.msra.mxu1 %v1361_v62 }
 0x50c   : > { %2035 = vmatprep.subr.mxu0 %v1376_v63  ;;  %2254 = vmatprep.subr.mxu1 %v1376_v63 }
 0x50f   : > { %2036 = vmatpush3.xpose.msra.mxu0 %v1360_v0  ;;  %2270 = vmatpush3.xpose.msra.mxu1 %v1360_v0 }
 0x510   : > { %2037 = vmatprep.subr.mxu0 %v1375_v1  ;;  %2255 = vmatprep.subr.mxu1 %v1375_v1 }
 0x513   : > { %2038 = vmatpush3.xpose.msra.mxu0 %v1359_v2  ;;  %2271 = vmatpush3.xpose.msra.mxu1 %v1359_v2 }
 0x514   : > { %2039 = vmatprep.subr.mxu0 %v1374_v4  ;;  %2256 = vmatprep.subr.mxu1 %v1374_v4 }
 0x517   : > { %2040 = vmatpush3.xpose.msra.mxu0 %v1358_v5  ;;  %2272 = vmatpush3.xpose.msra.mxu1 %v1358_v5 }
 0x518   : > { %2041 = vmatprep.subr.mxu0 %v1373_v8  ;;  %2257 = vmatprep.subr.mxu1 %v1373_v8 }
 0x51b   : > { %2042 = vmatpush3.xpose.msra.mxu0 %v1357_v9  ;;  %2273 = vmatpush3.xpose.msra.mxu1 %v1357_v9 }
 0x51c   : > { %2043 = vmatprep.subr.mxu0 %v1372_v10  ;;  %2258 = vmatprep.subr.mxu1 %v1372_v10 }
 0x51f   : > { %2044 = vmatpush3.xpose.msra.mxu0 %v1356_v11  ;;  %2274 = vmatpush3.xpose.msra.mxu1 %v1356_v11 }
 0x520   : > { %2045 = vmatprep.subr.mxu0 %v1371_v12  ;;  %2259 = vmatprep.subr.mxu1 %v1371_v12 }
 0x523   : > { %2046 = vmatpush3.xpose.msra.mxu0 %v1355_v13  ;;  %2275 = vmatpush3.xpose.msra.mxu1 %v1355_v13 }
 0x524   : > { %2047 = vmatprep.subr.mxu0 %v1370_v14  ;;  %2260 = vmatprep.subr.mxu1 %v1370_v14 }
 0x527   : > { %2048 = vmatpush3.xpose.msra.mxu0 %v1354_v15  ;;  %2276 = vmatpush3.xpose.msra.mxu1 %v1354_v15 }
 0x528   : > { %2049 = vmatprep.subr.mxu0 %v1369_v16  ;;  %2261 = vmatprep.subr.mxu1 %v1369_v16 }
 0x52b   : > { %2050 = vmatpush3.xpose.msra.mxu0 %v1353_v22  ;;  %2277 = vmatpush3.xpose.msra.mxu1 %v1353_v22 }
 0x52c   : > { %2051 = vmatprep.subr.mxu0 %v1368_v48  ;;  %2262 = vmatprep.subr.mxu1 %v1368_v48 }
 0x52f   : > { %2052 = vmatpush3.xpose.msra.mxu0 %v1352_v7  ;;  %2278 = vmatpush3.xpose.msra.mxu1 %v1352_v7 }
 0x530   : > { %2053 = vmatprep.subr.mxu0 %v1367_v49  ;;  %2263 = vmatprep.subr.mxu1 %v1367_v49 }
 0x533   : > { %2054 = vmatpush3.xpose.msra.mxu0 %v1351_v17  ;;  %2279 = vmatpush3.xpose.msra.mxu1 %v1351_v17 }
 0x534   : > { %2055 = vmatprep.subr.mxu0 %v1366_v18  ;;  %2264 = vmatprep.subr.mxu1 %v1366_v18 }
 0x537   : > { %2056 = vmatpush3.xpose.msra.mxu0 %v1350_v31  ;;  %2280 = vmatpush3.xpose.msra.mxu1 %v1350_v31 }
 0x53a   : > { %2058 = vmatmul.mubr.f32.vlgmr.msra.gmra.mxu0 %v3158_v58  ;;  %2074 = vmatmul.mubr.f32.vlgmr.msra.gmra.mxu1 %v3161_v60 }
 0x53b   : > { %2059 = vmatprep.mubr.f32.mxu0 %v1335_v38  ;;  %2075 = vmatprep.mubr.f32.mxu1 %v1343_v23 }
 0x53e   : > { %2060 = vmatmul.mubr.f32.gmra.mxu0 %v1335_v38  ;;  %2076 = vmatmul.mubr.f32.gmra.mxu1 %v1343_v23 }
 0x53f   : > { %2061 = vmatprep.mubr.f32.mxu0 %v1336_v34  ;;  %2077 = vmatprep.mubr.f32.mxu1 %v1344_v42 }
 0x542   : > { %2062 = vmatmul.mubr.f32.gmra.mxu0 %v1336_v34  ;;  %2078 = vmatmul.mubr.f32.gmra.mxu1 %v1344_v42 }
 0x543   : > { %2063 = vmatprep.mubr.f32.mxu0 %v1337_v19  ;;  %2079 = vmatprep.mubr.f32.mxu1 %v1345_v39 }
 0x546   : > { %2064 = vmatmul.mubr.f32.gmra.mxu0 %v1337_v19  ;;  %2080 = vmatmul.mubr.f32.gmra.mxu1 %v1345_v39 }
 0x547   : > { %2065 = vmatprep.mubr.f32.mxu0 %v1338_v3  ;;  %2081 = vmatprep.mubr.f32.mxu1 %v1346_v30 }
 0x54a   : > { %2066 = vmatmul.mubr.f32.gmra.mxu0 %v1338_v3  ;;  %2082 = vmatmul.mubr.f32.gmra.mxu1 %v1346_v30 }
 0x54b   : > { %2067 = vmatprep.mubr.f32.mxu0 %v1339_v35  ;;  %2083 = vmatprep.mubr.f32.mxu1 %v1347_v27 }
 0x54e   : > { %2068 = vmatmul.mubr.f32.gmra.mxu0 %v1339_v35  ;;  %2084 = vmatmul.mubr.f32.gmra.mxu1 %v1347_v27 }
 0x54f   : > { %2069 = vmatprep.mubr.f32.mxu0 %v1340_v26  ;;  %2085 = vmatprep.mubr.f32.mxu1 %v1348_v6 }
 0x552   : > { %2070 = vmatmul.mubr.f32.gmra.mxu0 %v1340_v26  ;;  %2086 = vmatmul.mubr.f32.gmra.mxu1 %v1348_v6 }
 0x553   : > { %2071 = vmatprep.mubr.f32.mxu0 %v1341_v20  ;;  %2087 = vmatprep.mubr.f32.mxu1 %v1349_v21 }
 0x556   : > { %2072 = vmatmul.mubr.f32.gmra.mxu0 %v1341_v20  ;;  %2088 = vmatmul.mubr.f32.gmra.mxu1 %v1349_v21 }
 0x5fa   : > { %v1448_v24 = vpop.f32.mrf.mxu0  ;;  %v1496_v25 = vpop.f32.mrf.mxu1 }
 0x5fb   : > { %v1889_v28 = vmul.f32 -1.442695, %v1448_v24  ;;  %v1905_v29 = vmul.f32 -1.442695, %v1496_v25 }
 0x5fc   : > { %v1450_v32 = vpop.f32.mrf.mxu0  ;;  %v1498_v33 = vpop.f32.mrf.mxu1 }
 0x5fd   : > { %2368 = vpow2.f32 %v1889_v28  ;;  %v1890_v36 = vmul.f32 -1.442695, %v1450_v32  ;;  %v1906_v37 = vmul.f32 -1.442695, %v1498_v33 }
 0x5fe   : > { %2370 = vpow2.f32 %v1905_v29  ;;  %v1454_v40 = vpop.f32.mrf.mxu0  ;;  %v1502_v41 = vpop.f32.mrf.mxu1 }
 0x5ff   : > { %2372 = vpow2.f32 %v1890_v36  ;;  %v1891_v43 = vmul.f32 -1.442695, %v1454_v40  ;;  %v1907_v44 = vmul.f32 -1.442695, %v1502_v41 }
 0x600   : > { %2374 = vpow2.f32 %v1906_v37  ;;  %v1456_v45 = vpop.f32.mrf.mxu0  ;;  %v1504_v46 = vpop.f32.mrf.mxu1 }
 0x601   : > { %2376 = vpow2.f32 %v1891_v43  ;;  %v1892_v47 = vmul.f32 -1.442695, %v1456_v45  ;;  %v1908_v50 = vmul.f32 -1.442695, %v1504_v46 }
 0x602   : > { %2378 = vpow2.f32 %v1907_v44  ;;  %v1460_v51 = vpop.f32.mrf.mxu0  ;;  %v1508_v52 = vpop.f32.mrf.mxu1 }
 0x603   : > { %2380 = vpow2.f32 %v1892_v47  ;;  %v1893_v53 = vmul.f32 -1.442695, %v1460_v51  ;;  %v1909_v54 = vmul.f32 -1.442695, %v1508_v52 }
 0x604   : > { %2382 = vpow2.f32 %v1908_v50  ;;  %v1462_v55 = vpop.f32.mrf.mxu0  ;;  %v1510_v56 = vpop.f32.mrf.mxu1 }
 0x605   : > { %2384 = vpow2.f32 %v1893_v53  ;;  %v1894_v57 = vmul.f32 -1.442695, %v1462_v55  ;;  %v1910_v58 = vmul.f32 -1.442695, %v1510_v56 }
 0x606   : > { %2386 = vpow2.f32 %v1909_v54  ;;  %v1466_v59 = vpop.f32.mrf.mxu0  ;;  %v1514_v60 = vpop.f32.mrf.mxu1 }
 0x607   : > { %2388 = vpow2.f32 %v1894_v57  ;;  %v1895_v61 = vmul.f32 -1.442695, %v1466_v59  ;;  %v1911_v62 = vmul.f32 -1.442695, %v1514_v60 }
 0x608   : > { %2390 = vpow2.f32 %v1910_v58  ;;  %v1468_v63 = vpop.f32.mrf.mxu0  ;;  %v1516_v0 = vpop.f32.mrf.mxu1 }
 0x609   : > { %2392 = vpow2.f32 %v1895_v61  ;;  %v1896_v1 = vmul.f32 -1.442695, %v1468_v63  ;;  %v1912_v2 = vmul.f32 -1.442695, %v1516_v0 }
 0x60a   : > { %v2369_v4 = vpop.eup %2368  ;;  %2394 = vpow2.f32 %v1911_v62  ;;  %v1472_v5 = vpop.f32.mrf.mxu0 }
 0x60b   : > { %v1520_v8 = vpop.f32.mrf.mxu1  ;;  %v2371_v9 = vpop.eup %2370  ;;  %v1639_v10 = vadd.f32 1.0, %v2369_v4  ;;  %2396 = vpow2.f32 %v1896_v1  ;;  %v1897_v40 = vmul.f32 -1.442695, %v1472_v5 }
 0x60c   : > { %v2373_v11 = vpop.eup %2372  ;;  %v1655_v12 = vadd.f32 1.0, %v2371_v9  ;;  %2398 = vpow2.f32 %v1912_v2  ;;  %v1474_v13 = vpop.f32.mrf.mxu0  ;;  %v1913_v45 = vmul.f32 -1.442695, %v1520_v8 }
 0x60d   : > { %v2375_v14 = vpop.eup %2374  ;;  %2400 = vrcp.f32 %v1639_v10  ;;  %v1640_v15 = vadd.f32 1.0, %v2373_v11  ;;  %v1522_v16 = vpop.f32.mrf.mxu1  ;;  %v1898_v47 = vmul.f32 -1.442695, %v1474_v13 }
 0x60e   : > { %v2377_v22 = vpop.eup %2376  ;;  %2402 = vrcp.f32 %v1655_v12  ;;  %v1656_v48 = vadd.f32 1.0, %v2375_v14  ;;  %v1478_v31 = vpop.f32.mrf.mxu0  ;;  %v1914_v51 = vmul.f32 -1.442695, %v1522_v16 }
 0x60f   : > { %v2379_v7 = vpop.eup %2378  ;;  %2404 = vrcp.f32 %v1640_v15  ;;  %v1641_v49 = vadd.f32 1.0, %v2377_v22  ;;  %v1526_v34 = vpop.f32.mrf.mxu1  ;;  %v1899_v54 = vmul.f32 -1.442695, %v1478_v31 }
 0x610   : > { %v2381_v17 = vpop.eup %2380  ;;  %2406 = vrcp.f32 %v1656_v48  ;;  %v1657_v18 = vadd.f32 1.0, %v2379_v7  ;;  %v1480_v27 = vpop.f32.mrf.mxu0  ;;  %v1915_v57 = vmul.f32 -1.442695, %v1526_v34 }
 0x611   : > { %v2383_v38 = vpop.eup %2382  ;;  %2408 = vrcp.f32 %v1641_v49  ;;  %v1642_v23 = vadd.f32 1.0, %v2381_v17  ;;  %v1528_v20 = vpop.f32.mrf.mxu1  ;;  %v1900_v59 = vmul.f32 -1.442695, %v1480_v27 }
 0x612   : > { %v2385_v42 = vpop.eup %2384  ;;  %2410 = vrcp.f32 %v1657_v18  ;;  %v1658_v19 = vadd.f32 1.0, %v2383_v38  ;;  %v1484_v33 = vpop.f32.mrf.mxu0  ;;  %v1916_v61 = vmul.f32 -1.442695, %v1528_v20 }
 0x613   : > { %v2387_v39 = vpop.eup %2386  ;;  %2412 = vrcp.f32 %v1642_v23  ;;  %v1643_v3 = vadd.f32 1.0, %v2385_v42  ;;  %v1532_v41 = vpop.f32.mrf.mxu1  ;;  %v1901_v0 = vmul.f32 -1.442695, %v1484_v33 }
 0x614   : > { %v2389_v30 = vpop.eup %2388  ;;  %2414 = vrcp.f32 %v1658_v19  ;;  %v1659_v35 = vadd.f32 1.0, %v2387_v39  ;;  %v1486_v52 = vpop.f32.mrf.mxu0  ;;  %v1917_v4 = vmul.f32 -1.442695, %v1532_v41 }
 0x615   : > { %v2391_v26 = vpop.eup %2390  ;;  %2416 = vrcp.f32 %v1643_v3  ;;  %v1644_v6 = vadd.f32 1.0, %v2389_v30  ;;  %v1534_v55 = vpop.f32.mrf.mxu1  ;;  %v1902_v8 = vmul.f32 -1.442695, %v1486_v52 }
 0x616   : > { %v2393_v21 = vpop.eup %2392  ;;  %2418 = vrcp.f32 %v1659_v35  ;;  %v1660_v24 = vadd.f32 1.0, %v2391_v26  ;;  %v1490_v62 = vpop.f32.mrf.mxu0  ;;  %v1918_v10 = vmul.f32 -1.442695, %v1534_v55 }
 0x617   : > { %v2395_v25 = vpop.eup %2394  ;;  %2420 = vrcp.f32 %v1644_v6  ;;  %v1645_v28 = vadd.f32 1.0, %v2393_v21  ;;  %v1538_v1 = vpop.f32.mrf.mxu1  ;;  %v1903_v13 = vmul.f32 -1.442695, %v1490_v62 }
 0x618   : > { %v2397_v29 = vpop.eup %2396  ;;  %2422 = vrcp.f32 %v1660_v24  ;;  %v1661_v32 = vadd.f32 1.0, %v2395_v25  ;;  %v1492_v11 = vpop.f32.mrf.mxu0  ;;  %v1919_v16 = vmul.f32 -1.442695, %v1538_v1 }
 0x619   : > { %v2399_v36 = vpop.eup %2398  ;;  %2424 = vrcp.f32 %v1645_v28  ;;  %v1646_v37 = vadd.f32 1.0, %v2397_v29  ;;  %v1540_v14 = vpop.f32.mrf.mxu1  ;;  %v1904_v48 = vmul.f32 -1.442695, %v1492_v11 }
 0x61a   : > { %v2401_v43 = vpop.eup %2400  ;;  %2426 = vrcp.f32 %v1661_v32  ;;  %v1662_v44 = vadd.f32 1.0, %v2399_v36  ;;  %v1920_v49 = vmul.f32 -1.442695, %v1540_v14 }
 0x61b   : > { %v2403_v46 = vpop.eup %2402  ;;  %1735 = vst [vmem:[%s2824_s10] sm:$0xff] %v2401_v43  ;;  %2428 = vrcp.f32 %v1646_v37 }
 0x61c   : > { %v2405_v50 = vpop.eup %2404  ;;  %1751 = vst [vmem:[%s2824_s10 + $0x80] sm:$0xff] %v2403_v46  ;;  %2430 = vrcp.f32 %v1662_v44 }
 0x61d   : > { %v2407_v53 = vpop.eup %2406  ;;  %1736 = vst [vmem:[%s2824_s10 + $0x8] sm:$0xff] %v2405_v50  ;;  %2432 = vpow2.f32 %v1897_v40 }
 0x61e   : > { %v2409_v56 = vpop.eup %2408  ;;  %1752 = vst [vmem:[%s2824_s10 + $0x88] sm:$0xff] %v2407_v53  ;;  %2434 = vpow2.f32 %v1913_v45 }
 0x61f   : > { %v2411_v58 = vpop.eup %2410  ;;  %1737 = vst [vmem:[%s2824_s10 + $0x10] sm:$0xff] %v2409_v56  ;;  %2436 = vpow2.f32 %v1898_v47 }
 0x620   : > { %v2413_v60 = vpop.eup %2412  ;;  %1753 = vst [vmem:[%s2824_s10 + $0x90] sm:$0xff] %v2411_v58  ;;  %2438 = vpow2.f32 %v1914_v51 }
 0x621   : > { %v2415_v63 = vpop.eup %2414  ;;  %1738 = vst [vmem:[%s2824_s10 + $0x18] sm:$0xff] %v2413_v60  ;;  %2440 = vpow2.f32 %v1899_v54 }
 0x622   : > { %v2417_v2 = vpop.eup %2416  ;;  %1754 = vst [vmem:[%s2824_s10 + $0x98] sm:$0xff] %v2415_v63  ;;  %2442 = vpow2.f32 %v1915_v57 }
 0x623   : > { %v2419_v5 = vpop.eup %2418  ;;  %1739 = vst [vmem:[%s2824_s10 + $0x20] sm:$0xff] %v2417_v2  ;;  %2444 = vpow2.f32 %v1900_v59 }
 0x624   : > { %v2421_v9 = vpop.eup %2420  ;;  %1755 = vst [vmem:[%s2824_s10 + $0xa0] sm:$0xff] %v2419_v5  ;;  %2446 = vpow2.f32 %v1916_v61 }
 0x625   : > { %v2423_v12 = vpop.eup %2422  ;;  %1740 = vst [vmem:[%s2824_s10 + $0x28] sm:$0xff] %v2421_v9  ;;  %2448 = vpow2.f32 %v1901_v0 }
 0x626   : > { %v2425_v15 = vpop.eup %2424  ;;  %1756 = vst [vmem:[%s2824_s10 + $0xa8] sm:$0xff] %v2423_v12  ;;  %2450 = vpow2.f32 %v1917_v4 }
 0x627   : > { %v2427_v22 = vpop.eup %2426  ;;  %1741 = vst [vmem:[%s2824_s10 + $0x30] sm:$0xff] %v2425_v15  ;;  %2452 = vpow2.f32 %v1902_v8 }
 0x628   : > { %v2429_v7 = vpop.eup %2428  ;;  %1757 = vst [vmem:[%s2824_s10 + $0xb0] sm:$0xff] %v2427_v22  ;;  %2454 = vpow2.f32 %v1918_v10 }
 0x629   : > { %v2431_v17 = vpop.eup %2430  ;;  %1742 = vst [vmem:[%s2824_s10 + $0x38] sm:$0xff] %v2429_v7  ;;  %2456 = vpow2.f32 %v1903_v13 }
 0x62a   : > { %v2433_v18 = vpop.eup %2432  ;;  %1758 = vst [vmem:[%s2824_s10 + $0xb8] sm:$0xff] %v2431_v17  ;;  %2458 = vpow2.f32 %v1919_v16 }
 0x62b   : > { %v2435_v31 = vpop.eup %2434  ;;  %v1647_v38 = vadd.f32 1.0, %v2433_v18  ;;  %2460 = vpow2.f32 %v1904_v48 }
 0x62c   : > { %v2437_v23 = vpop.eup %2436  ;;  %v1663_v34 = vadd.f32 1.0, %v2435_v31  ;;  %2462 = vpow2.f32 %v1920_v49 }
 0x62d   : > { %v2439_v42 = vpop.eup %2438  ;;  %2464 = vrcp.f32 %v1647_v38  ;;  %v1648_v19 = vadd.f32 1.0, %v2437_v23 }
 0x62e   : > { %v2441_v39 = vpop.eup %2440  ;;  %2466 = vrcp.f32 %v1663_v34  ;;  %v1664_v3 = vadd.f32 1.0, %v2439_v42 }
 0x62f   : > { %v2443_v30 = vpop.eup %2442  ;;  %2468 = vrcp.f32 %v1648_v19  ;;  %v1649_v35 = vadd.f32 1.0, %v2441_v39 }
 0x630   : > { %v2445_v27 = vpop.eup %2444  ;;  %2470 = vrcp.f32 %v1664_v3  ;;  %v1665_v26 = vadd.f32 1.0, %v2443_v30 }
 0x631   : > { %v2447_v6 = vpop.eup %2446  ;;  %2472 = vrcp.f32 %v1649_v35  ;;  %v1650_v20 = vadd.f32 1.0, %v2445_v27 }
 0x632   : > { %v2449_v21 = vpop.eup %2448  ;;  %2474 = vrcp.f32 %v1665_v26  ;;  %v1666_v24 = vadd.f32 1.0, %v2447_v6 }
 0x633   : > { %v2451_v25 = vpop.eup %2450  ;;  %2476 = vrcp.f32 %v1650_v20  ;;  %v1651_v28 = vadd.f32 1.0, %v2449_v21 }
 0x634   : > { %v2453_v29 = vpop.eup %2452  ;;  %2478 = vrcp.f32 %v1666_v24  ;;  %v1667_v32 = vadd.f32 1.0, %v2451_v25 }
 0x635   : > { %v2455_v33 = vpop.eup %2454  ;;  %2480 = vrcp.f32 %v1651_v28  ;;  %v1652_v36 = vadd.f32 1.0, %v2453_v29 }
 0x636   : > { %v2457_v37 = vpop.eup %2456  ;;  %2482 = vrcp.f32 %v1667_v32  ;;  %v1668_v40 = vadd.f32 1.0, %v2455_v33 }
 0x637   : > { %v2459_v41 = vpop.eup %2458  ;;  %2484 = vrcp.f32 %v1652_v36  ;;  %v1653_v43 = vadd.f32 1.0, %v2457_v37 }
 0x638   : > { %v2461_v44 = vpop.eup %2460  ;;  %2486 = vrcp.f32 %v1668_v40  ;;  %v1669_v45 = vadd.f32 1.0, %v2459_v41 }
 0x639   : > { %v2463_v46 = vpop.eup %2462  ;;  %2488 = vrcp.f32 %v1653_v43  ;;  %v1654_v47 = vadd.f32 1.0, %v2461_v44 }
 0x63a   : > { %v2465_v50 = vpop.eup %2464  ;;  %2490 = vrcp.f32 %v1669_v45  ;;  %v1670_v51 = vadd.f32 1.0, %v2463_v46 }
 0x63b   : > { %v2467_v52 = vpop.eup %2466  ;;  %1743 = vst [vmem:[%s2824_s10 + $0x40] sm:$0xff] %v2465_v50  ;;  %2492 = vrcp.f32 %v1654_v47 }
 0x63c   : > { %v2469_v53 = vpop.eup %2468  ;;  %1759 = vst [vmem:[%s2824_s10 + $0xc0] sm:$0xff] %v2467_v52  ;;  %2494 = vrcp.f32 %v1670_v51 }
 0x63d   : > { %v2471_v54 = vpop.eup %2470  ;;  %1744 = vst [vmem:[%s2824_s10 + $0x48] sm:$0xff] %v2469_v53 }
 0x63e   : > { %v2473_v55 = vpop.eup %2472  ;;  %1760 = vst [vmem:[%s2824_s10 + $0xc8] sm:$0xff] %v2471_v54 }
 0x63f   : > { %v2475_v56 = vpop.eup %2474  ;;  %1745 = vst [vmem:[%s2824_s10 + $0x50] sm:$0xff] %v2473_v55 }
 0x640   : > { %v2477_v57 = vpop.eup %2476  ;;  %1761 = vst [vmem:[%s2824_s10 + $0xd0] sm:$0xff] %v2475_v56 }
 0x641   : > { %v2479_v58 = vpop.eup %2478  ;;  %1746 = vst [vmem:[%s2824_s10 + $0x58] sm:$0xff] %v2477_v57 }
 0x642   : > { %v2481_v59 = vpop.eup %2480  ;;  %1762 = vst [vmem:[%s2824_s10 + $0xd8] sm:$0xff] %v2479_v58 }
 0x643   : > { %v2483_v60 = vpop.eup %2482  ;;  %1747 = vst [vmem:[%s2824_s10 + $0x60] sm:$0xff] %v2481_v59 }
 0x644   : > { %v2485_v61 = vpop.eup %2484  ;;  %1763 = vst [vmem:[%s2824_s10 + $0xe0] sm:$0xff] %v2483_v60 }
 0x645   : > { %v2487_v62 = vpop.eup %2486  ;;  %1748 = vst [vmem:[%s2824_s10 + $0x68] sm:$0xff] %v2485_v61 }
 0x646   : > { %v2489_v63 = vpop.eup %2488  ;;  %1764 = vst [vmem:[%s2824_s10 + $0xe8] sm:$0xff] %v2487_v62 }
 0x647   : > { %v2491_v0 = vpop.eup %2490  ;;  %1749 = vst [vmem:[%s2824_s10 + $0x70] sm:$0xff] %v2489_v63 }
 0x648   : > { %v2493_v1 = vpop.eup %2492  ;;  %1765 = vst [vmem:[%s2824_s10 + $0xf0] sm:$0xff] %v2491_v0 }
 0x649   : > { %v2495_v2 = vpop.eup %2494  ;;  %1750 = vst [vmem:[%s2824_s10 + $0x78] sm:$0xff] %v2493_v1 }
 0x64a   : > { %1766 = vst [vmem:[%s2824_s10 + $0xf8] sm:$0xff] %v2495_v2 }
 0x64b   : > { %2613 = shalt.err (!%p2610_p9)
}
 0x64c   : > { %s2614_s12 = scalar_lea.hbm %s3215_s29, 4096  ;;  %s2618_s27 = scalar_lea.hbm %s3268_s4, 8192 }
 0x64d   : > { %p2615_p0 = scmp.ne.s32.totalorder %s3215_s29, %s2614_s12  ;;  %p2619_p6 = scmp.lt.s32.totalorder %s3215_s29, %s3268_s4 }
 0x64e   : > { %p2620_p13 = scmp.lt.s32.totalorder %s2618_s27, %s2614_s12 }
 0x64f   : > { %p2616_p12 = pnand %p2615_p0, %p3339_p2 }
 0x650   : > { %p2621_p11 = por %p2620_p13, %p2619_p6 }
 0x651   : > { %p2617_p1 = pneg %p2616_p12 }
 0x653   : > { %p2622_p10 = pnand %p2621_p11, %p2617_p1 }
 0x655   : > { %2625 = shalt.err (!%p2622_p10)
}
 0x656   : > { %s2684_s11 = smov 256   ;;  %s2685_s14 = smov 16  }
 0x657   : > { %2297 = dma.vmem_to_hbm [thread:$0]  (%p3339_p2), %s3217_s22, 4096, %s3215_s29, %s3224_s19, %s2684_s11, %s2684_s11, %s2685_s14  }
 0x658 PF: > { %p2324_p4 = scmp.ge.s32.totalorder %s2672_s18, 2  ;;  %s1797_s20 = sand.u32 1, %s2660_s15  }
 0x659   : > { %p3340_p3 = scmp.ne.s32.totalorder %s3292_s26, 0  ;;  %s1798_s23 = scalar_lea.sflag [#allocation5], %s1797_s20 }
 0x65b   : > { %p2313_p7 = pnand %p2324_p4, %p3340_p3 }
 0x65d   : > { %p2314_p5 = pneg %p2313_p7 }
 0x65f   : > { %2655 = dma.done.wait (%p2314_p5), %s1798_s23, 4096  }
 0x660   : > { %2657 = vsyncadd (%p2314_p5), %s1798_s23, 4294963200  ;;  %p17_p8 = scmp.ge.s32.totalorder %s2736_s21, 4   ;;  %s3341_s15 = smov %s2664_s16 }
 0x661   : > { %s3342_s16 = smov %s2668_s17  ;;  %s3343_s17 = smov %s2747_s24 }
 0x662   : > { %s3344_s18 = smov %s2736_s21  ;;  %19 = sbr.rel (!%p17_p8) target bundleno = 6 (0x6), region = 90 }
 0x667   :  { %1803 = vsyncpa [#allocation4], 1 }
 0x668   :  { %1805 = vsyncpa [#allocation4 + $0x1], 1 }
 0x669   :  { %1806 = vsyncpa [#allocation7], 1 }
 0x66a   :  { %1807 = vsyncpa [#allocation10], 1 }
 0x66b   :  { %1808 = vsyncpa [#allocation5], 1 }
 0x66c   :  { %1810 = vsyncpa [#allocation5 + $0x1], 1 }

</bundles_post_ra>
